<compile_context>
chip_gen: v7x
topology: tpu7x:2x2x1
jax: 0.10.0
libtpu: 0.0.40
codegen_flags: <defaults>
</compile_context>

<pallas_src>
import itertools
import numpy as np

import jax
import jax.numpy as jnp
from jax.experimental import pallas as pl
from jax.experimental.pallas import tpu as pltpu

NUM_BLADES = 16
ACTION_BLADES = (0, 5, 6, 7, 8, 9, 10, 15)  # scalar, e01,e02,e03, e12,e13,e23, e0123
LANE = 128


def _round_up(x, m):
    return ((x + m - 1) // m) * m


def _choose_row_tile(rows):
    """Large row tiles fill the MXU and amortize per-grid-step overhead.  Clamp so the
    grid keeps >= 2 blocks when rows permit (v7x has 2 TensorCores per chip); tiny
    inputs fall back to a single sublane-aligned tile."""
    if rows <= 128:
        return max(8, _round_up(rows, 8))
    cap = 1024 if rows >= 8192 else 512
    tm = min(cap, _round_up(max(rows // 2, 128), 128))
    return max(128, tm)


# ----------------------------------------------------------------------------------
# Projective geometric algebra (0,1,1,1) tables (pure setup, numpy)
# ----------------------------------------------------------------------------------
def build_pga_tables():
    metric = [0.0, 1.0, 1.0, 1.0]
    blades = [()]
    for g in range(1, 5):
        blades += list(itertools.combinations(range(4), g))
    index = {b: i for i, b in enumerate(blades)}
    n = len(blades)
    cayley = np.zeros((n, n, n), dtype=np.float32)
    for i, bi in enumerate(blades):
        for j, bj in enumerate(blades):
            arr = list(bi) + list(bj)
            sign = 1.0
            changed = True
            while changed:  # bubble sort, count swaps (anticommuting basis vectors)
                changed = False
                for t in range(len(arr) - 1):
                    if arr[t] > arr[t + 1]:
                        arr[t], arr[t + 1] = arr[t + 1], arr[t]
                        sign *= -1.0
                        changed = True
            res = []
            t = 0
            while t < len(arr):  # contract repeated basis vectors with the metric
                if t + 1 < len(arr) and arr[t] == arr[t + 1]:
                    sign *= metric[arr[t]]
                    t += 2
                else:
                    res.append(arr[t])
                    t += 1
            if sign != 0.0:
                cayley[i, j, index[tuple(res)]] += sign
    grades = np.array([len(b) for b in blades])
    rev_signs = ((-1.0) ** (grades * (grades - 1) // 2)).astype(np.float32)
    return jnp.asarray(cayley), jnp.asarray(rev_signs)


# ----------------------------------------------------------------------------------
# Parameter construction (deterministic, in-script)
# ----------------------------------------------------------------------------------
def _embed_action(act8):
    O, I, _ = act8.shape
    full = jnp.zeros((O, I, NUM_BLADES), dtype=act8.dtype)
    return full.at[..., jnp.array(ACTION_BLADES)].set(act8)


def _init_action(key, out_ch, in_ch):
    k1, k2 = jax.random.split(key)
    # rotor part (scalar, e12, e13, e23) ~ U(-1,1), normalized (PGA norm only sees these)
    rot = jax.random.uniform(k1, (out_ch, in_ch, 4), minval=-1.0, maxval=1.0)
    rot = rot / jnp.sqrt(jnp.sum(rot ** 2, axis=-1, keepdims=True))
    # translation-like part (e01, e02, e03, e0123) small
    trans = 0.1 * jax.random.uniform(k2, (out_ch, in_ch, 4), minval=-1.0, maxval=1.0)
    # action_blade order: (scalar, e01, e02, e03, e12, e13, e23, e0123)
    act8 = jnp.concatenate([rot[..., :1], trans[..., :3], rot[..., 1:], trans[..., 3:]], axis=-1)
    return act8


def build_conj_linear_matrix(W, action, cayley, rev_signs):
    """PGAConjugateLinear: out[b,o] = sum_i W[o,i] * (k[o,i] * x[b,i] * reverse(k[o,i])).

    Folded into a single (I*16, O*16) matrix acting on blade-flattened inputs.
    """
    k = action                      # (O, I, 16)
    kr = action * rev_signs         # reverse(k)
    left = jnp.einsum('oia,aqm->oiqm', k, cayley)                  # (k * e_q)_m
    S = jnp.einsum('oiqm,oib,mbp->oipq', left, kr, cayley)         # ((k*e_q)*kr)_p
    T = W[:, :, None, None] * S
    O, I = W.shape
    return jnp.transpose(T, (1, 3, 0, 2)).reshape(I * NUM_BLADES, O * NUM_BLADES)


def build_gate_reduce_matrix(cw):
    """MultiVectorAct(agg='linear') grouped Conv1d(kernel=16), reduce part only:
    logit[b, c] = sum_k cw[c, k] * x[b, c*16 + k]."""
    C = cw.shape[0]
    G = jnp.einsum('ck,cd->ckd', cw, jnp.eye(C, dtype=cw.dtype))   # (C, 16, C)
    return G.reshape(C * NUM_BLADES, C)


def build_gate_expand_matrix(channels, dtype=jnp.float32):
    """Binary matrix broadcasting a per-channel gate back over its 16 blades."""
    E = jnp.broadcast_to(jnp.eye(channels, dtype=dtype)[:, :, None],
                         (channels, channels, NUM_BLADES))
    return E.reshape(channels, channels * NUM_BLADES)


def init_gcamlp_params(key, in_ch_a, in_ch_b, out_ch, hidden_ch, hidden_layers,
                       cayley, rev_signs):
    """GCAMLP operating on the (folded) concatenation of two channel blocks (a | b).

    Each gate's reduce matrix G is folded into the *preceding* conjugate-linear matrix
    as extra columns, so the kernel gets the gate logits for free from the same MXU pass.
    """
    assert hidden_layers > 0
    in_ch = in_ch_a + in_ch_b
    num_linears = hidden_layers + 1          # linears l = 0..num_linears-1
    num_hidden = hidden_layers               # gates s = 0..num_hidden-1 (before linear s+1)
    dims = [in_ch] + [hidden_ch] * hidden_layers + [out_ch]
    keys = jax.random.split(key, num_linears)

    linears, gate_G, gate_b = [], [], []
    for l in range(num_linears):
        if l == 0:
            kact, kw = jax.random.split(keys[0])
        else:
            kact, kw, kc = jax.random.split(keys[l], 3)
            kcw, kcb = jax.random.split(kc)
            cin = dims[l]
            cw = jax.random.uniform(kcw, (cin, NUM_BLADES), minval=-0.25, maxval=0.25)
            cb = jax.random.uniform(kcb, (cin,), minval=-0.25, maxval=0.25)
            gate_G.append(build_gate_reduce_matrix(cw))   # gate s = l-1, (dims[l]*16, dims[l])
            gate_b.append(cb[None, :])
        action = _embed_action(_init_action(kact, dims[l + 1], dims[l]))
        bound = 1.0 / np.sqrt(dims[l])
        W = jax.random.uniform(kw, (dims[l + 1], dims[l]), minval=-bound, maxval=bound)
        linears.append(build_conj_linear_matrix(W, action, cayley, rev_signs))

    # Fold gate-reduce columns into the preceding linear: [L_s | L_s @ G_s].
    aug = []
    split_widths = []
    for s in range(num_hidden):
        T = linears[s]
        aug.append(jnp.concatenate([T, T @ gate_G[s]], axis=1))
        split_widths.append(dims[s + 1] * NUM_BLADES)

    # Last linear: lane-dense output -> zero-pad columns to a multiple of 128 lanes.
    T_last = linears[num_hidden]
    dout = out_ch * NUM_BLADES
    dpad = _round_up(max(dout, LANE), LANE)
    if dpad != dout:
        T_last = jnp.pad(T_last, ((0, 0), (0, dpad - dout)))

    # First linear is split row-wise so the kernel consumes the two inputs of the channel
    # concatenation separately (no HBM concat round-trip).
    da = in_ch_a * NUM_BLADES
    T0 = aug[0]

    mlp = {
        'T0a': T0[:da].astype(jnp.bfloat16),
        'T0b': T0[da:].astype(jnp.bfloat16),
        'E': build_gate_expand_matrix(hidden_ch).astype(jnp.bfloat16),  # 0/1, exact in bf16
        'hidden': [],
        'dout': dout,
        'dpad': dpad,
        'split_widths': tuple(split_widths),
        'gate_channels': tuple(dims[s + 1] for s in range(num_hidden)),
    }
    for s in range(num_hidden):
        T_next = aug[s + 1] if s + 1 < num_hidden else T_last
        mlp['hidden'].append({
            'b': gate_b[s].astype(jnp.float32),     # (1, C) gate bias
            'T': T_next.astype(jnp.bfloat16),       # next linear (augmented unless last)
        })
    return mlp


def init_gcagnn_params(key, in_channels, out_channels, node_channels, message_channels,
                       mlp_hidden_channels, mlp_hidden_layers, message_passing_steps,
                       cayley, rev_signs):
    layer_io = ([(in_channels, node_channels)]
                + [(node_channels, node_channels)] * (message_passing_steps - 2)
                + [(node_channels, out_channels)])
    keys = jax.random.split(key, len(layer_io))
    layers = []
    for k, (cin, cout) in zip(keys, layer_io):
        km, ku = jax.random.split(k)
        # message MLP: input is cat([x_i, x_j]) -> split (cin | cin)
        msg = init_gcamlp_params(km, cin, cin, message_channels,
                                 mlp_hidden_channels, mlp_hidden_layers, cayley, rev_signs)
        # update MLP: input is cat([x, aggr]) -> split (cin | message_channels)
        upd = init_gcamlp_params(ku, cin, message_channels, cout,
                                 mlp_hidden_channels, mlp_hidden_layers, cayley, rev_signs)
        layers.append((msg, upd))
    return layers


# ----------------------------------------------------------------------------------
# Pallas kernel: one fused GCAMLP (matmul chain + sigmoid gating) on blade-flat rows
# ----------------------------------------------------------------------------------
def make_pair_mlp_kernel(num_hidden, split_widths):
    """refs: xa, xb, T0a, T0b, E, (b_s, T_s) * num_hidden, out."""
    def kernel(xa_ref, xb_ref, t0a_ref, t0b_ref, e_ref, *rest):
        o_ref = rest[-1]
        p = rest[:-1]
        # f32 inputs cast to bf16 in VMEM; MXU accumulates in f32.  The channel
        # concatenation [x_a | x_b] is folded into the row-split of T0.
        xa = xa_ref[...].astype(jnp.bfloat16)
        xb = xb_ref[...].astype(jnp.bfloat16)
        # First PGAConjugateLinear; the gate-reduce columns ride in the same matmul.
        h_full = (jnp.dot(xa, t0a_ref[...], preferred_element_type=jnp.float32)
                  + jnp.dot(xb, t0b_ref[...], preferred_element_type=jnp.float32))
        e = e_ref[...]                                  # (C, C*16) binary, bf16
        for s in range(num_hidden):
            b_ref, t_ref = p[2 * s], p[2 * s + 1]
            n = split_widths[s]                         # static
            h = h_full[:, :n]                           # linear output (lane-aligned slice)
            logit = h_full[:, n:] + b_ref[...]          # folded gate logits, (TM, C)
            gate = jax.nn.sigmoid(logit)                # f32 sigmoid (EUP)
            gexp = jnp.dot(gate.astype(jnp.bfloat16), e,
                           preferred_element_type=jnp.float32)   # broadcast over blades
            h = h * gexp
            # Next PGAConjugateLinear (augmented with the next gate's reduce columns,
            # or lane-padded if it is the last one).
            h_full = jnp.dot(h.astype(jnp.bfloat16), t_ref[...],
                             preferred_element_type=jnp.float32)
        o_ref[...] = h_full.astype(o_ref.dtype)
    return kernel


def gcamlp_apply_pair(xa, xb, mlp, out_dtype=jnp.float32):
    """xa: (rows, Ca, 16), xb: (rows, Cb, 16) -> (rows, Cout, 16), one fused kernel."""
    rows = xa.shape[0]
    da = xa.shape[1] * NUM_BLADES
    db = xb.shape[1] * NUM_BLADES
    assert da == mlp['T0a'].shape[0] and db == mlp['T0b'].shape[0]
    dout, dpad = mlp['dout'], mlp['dpad']
    num_hidden = len(mlp['hidden'])

    # f32 activations go straight into the kernel (bf16 cast happens in VMEM); no
    # wrapper-side cast / pad HBM passes.  reshape is layout-free (blade index fastest).
    xa_f = xa.reshape(rows, da)
    xb_f = xb.reshape(rows, db)

    tm = _choose_row_tile(rows)
    grid = (pl.cdiv(rows, tm),)   # ragged last block: rows are independent, safe

    weights = [mlp['T0a'], mlp['T0b'], mlp['E']]
    for hl in mlp['hidden']:
        weights += [hl['b'], hl['T']]

    in_specs = [pl.BlockSpec((tm, da), lambda i: (i, 0)),
                pl.BlockSpec((tm, db), lambda i: (i, 0))]
    # Constant-index weight blocks: Mosaic skips re-DMA across grid steps.
    in_specs += [pl.BlockSpec(w.shape, lambda i: (0, 0)) for w in weights]

    # Cost estimate so XLA overlaps gather / segment_sum with the kernel.
    flops = 2 * rows * (da + db) * mlp['T0a'].shape[1]
    trans = 0
    for s, hl in enumerate(mlp['hidden']):
        n = mlp['split_widths'][s]
        c = mlp['gate_channels'][s]
        flops += 2 * rows * (c * n + n * hl['T'].shape[1])
        trans += rows * c
    out_itemsize = jnp.dtype(out_dtype).itemsize
    weight_bytes = sum(int(w.size) * w.dtype.itemsize for w in weights)
    bytes_accessed = rows * (da + db) * 4 + rows * dpad * out_itemsize + weight_bytes
    cost = pl.CostEstimate(flops=int(flops), transcendentals=int(trans),
                           bytes_accessed=int(bytes_accessed))

    # VMEM sizing from the actual footprint (double-buffered I/O + weights + temps),
    # with headroom; capped well below v7x's 64 MiB physical VMEM.
    act_block = tm * (da + db) * 4
    out_block = tm * dpad * out_itemsize
    max_width = max([mlp['T0a'].shape[1]] + [hl['T'].shape[1] for hl in mlp['hidden']])
    interm = tm * max_width * 4 * 3
    needed = 2 * (act_block + out_block + weight_bytes) + interm
    vmem_limit = int(min(max(needed + (8 << 20), 32 << 20), 56 << 20))

    out_flat = pl.pallas_call(
        make_pair_mlp_kernel(num_hidden, mlp['split_widths']),
        out_shape=jax.ShapeDtypeStruct((rows, dpad), out_dtype),
        grid=grid,
        in_specs=in_specs,
        out_specs=pl.BlockSpec((tm, dpad), lambda i: (i, 0)),
        compiler_params=pltpu.CompilerParams(
            dimension_semantics=("parallel",),
            vmem_limit_bytes=vmem_limit),
        cost_estimate=cost,
    )(xa_f, xb_f, *weights)

    if dout != dpad:
        out_flat = out_flat[:, :dout]
    return out_flat.reshape(rows, dout // NUM_BLADES, NUM_BLADES)


# ----------------------------------------------------------------------------------
# GCA-GNN forward (message passing: aggr='add', flow='source_to_target')
# ----------------------------------------------------------------------------------
def gcagnn_layer(x, edge_index, msg_mlp, upd_mlp):
    src = edge_index[0]   # x_j
    tgt = edge_index[1]   # x_i
    # TODO(synk): edge gather stays in plain JAX (data-dependent row indexing); fusing it
    #             into the message kernel via scalar prefetch + DMA gather is future work.
    x_i = x[tgt]
    x_j = x[src]
    # message MLP on cat([x_i, x_j], axis=1), concat folded into the split T0.
    # Messages are written back in bf16 (halves edge-sized writeback); the scatter-add
    # accumulates in f32.
    msgs = gcamlp_apply_pair(x_i, x_j, msg_mlp, out_dtype=jnp.bfloat16)   # (E, Cmsg, 16)
    # TODO(synk): scatter-add aggregation stays in plain JAX.
    aggr = jax.ops.segment_sum(msgs.astype(jnp.float32), tgt,
                               num_segments=x.shape[0])                   # (N, Cmsg, 16)
    # update MLP on cat([x, aggr], axis=1), concat folded into the split T0
    return gcamlp_apply_pair(x, aggr, upd_mlp, out_dtype=jnp.float32)     # (N, Cout, 16)


def gcagnn_forward(x, edge_index, layers):
    for msg_mlp, upd_mlp in layers:
        x = gcagnn_layer(x, edge_index, msg_mlp, upd_mlp)
    return x


# ----------------------------------------------------------------------------------
if __name__ == "__main__":
    key = jax.random.PRNGKey(0)

    # small shapes consistent with the module
    num_nodes = 8
    in_channels = 4
    out_channels = 4
    node_channels = 8
    message_channels = 8
    mlp_hidden_channels = 8
    mlp_hidden_layers = 2
    message_passing_steps = 3

    cayley, rev_signs = build_pga_tables()

    kx, kp = jax.random.split(key)
    x = jax.random.normal(kx, (num_nodes, in_channels, NUM_BLADES), dtype=jnp.float32)

    # deterministic bidirectional ring graph: (2, 16) edge_index
    src = jnp.arange(num_nodes, dtype=jnp.int32)
    dst = (src + 1) % num_nodes
    edge_index = jnp.stack(
        [jnp.concatenate([src, dst]), jnp.concatenate([dst, src])], axis=0)

    params = init_gcagnn_params(
        kp, in_channels, out_channels, node_channels, message_channels,
        mlp_hidden_channels, mlp_hidden_layers, message_passing_steps,
        cayley, rev_signs)

    # params carry static Python ints (split widths, padded output width); close over
    # them so they stay static under jit instead of becoming traced leaves.
    fwd = jax.jit(lambda xx, ei: gcagnn_forward(xx, ei, params))
    out = jax.block_until_ready(fwd(x, edge_index))

    assert out.shape == (num_nodes, out_channels, NUM_BLADES), out.shape
    assert bool(jnp.all(jnp.isfinite(out)))
    print("KERNEL_OK")
</pallas_src>

<mosaic_0001>
module attributes {stable_mosaic.version = 11 : i64} {
  func.func @kernel(%arg0: i32, %arg1: memref<16x64xf32, #tpu.memory_space<vmem>>, %arg2: memref<16x64xf32, #tpu.memory_space<vmem>>, %arg3: memref<64x136xbf16, #tpu.memory_space<vmem>>, %arg4: memref<64x136xbf16, #tpu.memory_space<vmem>>, %arg5: memref<8x128xbf16, #tpu.memory_space<vmem>>, %arg6: memref<1x8xf32, #tpu.memory_space<vmem>>, %arg7: memref<128x136xbf16, #tpu.memory_space<vmem>>, %arg8: memref<1x8xf32, #tpu.memory_space<vmem>>, %arg9: memref<128x128xbf16, #tpu.memory_space<vmem>>, %arg10: memref<16x128xbf16, #tpu.memory_space<vmem>>) attributes {dimension_semantics = [#tpu.dimension_semantics<parallel>], iteration_bounds = array<i64: 1>, scalar_prefetch = 0 : i64, scratch_operands = 0 : i64, tpu.core_type = #tpu.core_type<tc>, window_params = [{transform_indices = @transform_0, window_bounds = array<i64: 16, 64>}, {transform_indices = @transform_1, window_bounds = array<i64: 16, 64>}, {pipeline_mode = #tpu.pipeline_mode<synchronous>, transform_indices = @transform_2, window_bounds = array<i64: 64, 136>}, {pipeline_mode = #tpu.pipeline_mode<synchronous>, transform_indices = @transform_3, window_bounds = array<i64: 64, 136>}, {pipeline_mode = #tpu.pipeline_mode<synchronous>, transform_indices = @transform_4, window_bounds = array<i64: 8, 128>}, {pipeline_mode = #tpu.pipeline_mode<synchronous>, transform_indices = @transform_5, window_bounds = array<i64: 1, 8>}, {pipeline_mode = #tpu.pipeline_mode<synchronous>, transform_indices = @transform_6, window_bounds = array<i64: 128, 136>}, {pipeline_mode = #tpu.pipeline_mode<synchronous>, transform_indices = @transform_7, window_bounds = array<i64: 1, 8>}, {pipeline_mode = #tpu.pipeline_mode<synchronous>, transform_indices = @transform_8, window_bounds = array<i64: 128, 128>}, {transform_indices = @transform_9, window_bounds = array<i64: 16, 128>}]} {
    %c0 = arith.constant 0 : index
    %c0_0 = arith.constant 0 : index
    %0 = vector.load %arg1[%c0, %c0_0] : memref<16x64xf32, #tpu.memory_space<vmem>>, vector<16x64xf32>
    %1 = arith.truncf %0 : vector<16x64xf32> to vector<16x64xbf16>
    %c0_1 = arith.constant 0 : index
    %c0_2 = arith.constant 0 : index
    %2 = vector.load %arg2[%c0_1, %c0_2] : memref<16x64xf32, #tpu.memory_space<vmem>>, vector<16x64xf32>
    %3 = arith.truncf %2 : vector<16x64xf32> to vector<16x64xbf16>
    %c0_3 = arith.constant 0 : index
    %c0_4 = arith.constant 0 : index
    %4 = vector.load %arg3[%c0_3, %c0_4] : memref<64x136xbf16, #tpu.memory_space<vmem>>, vector<64x136xbf16>
    %cst = arith.constant dense<0.000000e+00> : vector<16x136xf32>
    %5 = tpu.matmul %1, %4, %cst {dimension_numbers = #tpu.dot_dimension_numbers<[1], [0], [0], [1], [0, 0, 1, 1], [], []>} : vector<16x64xbf16>, vector<64x136xbf16>, vector<16x136xf32> -> vector<16x136xf32>
    %c0_5 = arith.constant 0 : index
    %c0_6 = arith.constant 0 : index
    %6 = vector.load %arg4[%c0_5, %c0_6] : memref<64x136xbf16, #tpu.memory_space<vmem>>, vector<64x136xbf16>
    %cst_7 = arith.constant dense<0.000000e+00> : vector<16x136xf32>
    %7 = tpu.matmul %3, %6, %cst_7 {dimension_numbers = #tpu.dot_dimension_numbers<[1], [0], [0], [1], [0, 0, 1, 1], [], []>} : vector<16x64xbf16>, vector<64x136xbf16>, vector<16x136xf32> -> vector<16x136xf32>
    %8 = arith.addf %5, %7 : vector<16x136xf32>
    %c0_8 = arith.constant 0 : index
    %c0_9 = arith.constant 0 : index
    %9 = vector.load %arg5[%c0_8, %c0_9] : memref<8x128xbf16, #tpu.memory_space<vmem>>, vector<8x128xbf16>
    %10 = vector.extract_strided_slice %8 {offsets = [0, 0], sizes = [16, 128], strides = [1, 1]} : vector<16x136xf32> to vector<16x128xf32>
    %11 = vector.extract_strided_slice %8 {offsets = [0, 128], sizes = [16, 8], strides = [1, 1]} : vector<16x136xf32> to vector<16x8xf32>
    %c0_10 = arith.constant 0 : index
    %c0_11 = arith.constant 0 : index
    %12 = vector.load %arg6[%c0_10, %c0_11] : memref<1x8xf32, #tpu.memory_space<vmem>>, vector<1x8xf32>
    %13 = vector.broadcast %12 : vector<1x8xf32> to vector<16x8xf32>
    %14 = arith.addf %11, %13 : vector<16x8xf32>
    %15 = arith.negf %14 : vector<16x8xf32>
    %16 = math.exp %15 : vector<16x8xf32>
    %cst_12 = arith.constant 1.000000e+00 : f32
    %17 = vector.broadcast %cst_12 : f32 to vector<16x8xf32>
    %18 = arith.addf %17, %16 : vector<16x8xf32>
    %19 = arith.divf %17, %18 : vector<16x8xf32>
    %20 = arith.truncf %19 : vector<16x8xf32> to vector<16x8xbf16>
    %cst_13 = arith.constant dense<0.000000e+00> : vector<16x128xf32>
    %21 = tpu.matmul %20, %9, %cst_13 {dimension_numbers = #tpu.dot_dimension_numbers<[1], [0], [0], [1], [0, 0, 1, 1], [], []>} : vector<16x8xbf16>, vector<8x128xbf16>, vector<16x128xf32> -> vector<16x128xf32>
    %22 = arith.mulf %10, %21 : vector<16x128xf32>
    %23 = arith.truncf %22 : vector<16x128xf32> to vector<16x128xbf16>
    %c0_14 = arith.constant 0 : index
    %c0_15 = arith.constant 0 : index
    %24 = vector.load %arg7[%c0_14, %c0_15] : memref<128x136xbf16, #tpu.memory_space<vmem>>, vector<128x136xbf16>
    %cst_16 = arith.constant dense<0.000000e+00> : vector<16x136xf32>
    %25 = tpu.matmul %23, %24, %cst_16 {dimension_numbers = #tpu.dot_dimension_numbers<[1], [0], [0], [1], [0, 0, 1, 1], [], []>} : vector<16x128xbf16>, vector<128x136xbf16>, vector<16x136xf32> -> vector<16x136xf32>
    %26 = vector.extract_strided_slice %25 {offsets = [0, 0], sizes = [16, 128], strides = [1, 1]} : vector<16x136xf32> to vector<16x128xf32>
    %27 = vector.extract_strided_slice %25 {offsets = [0, 128], sizes = [16, 8], strides = [1, 1]} : vector<16x136xf32> to vector<16x8xf32>
    %c0_17 = arith.constant 0 : index
    %c0_18 = arith.constant 0 : index
    %28 = vector.load %arg8[%c0_17, %c0_18] : memref<1x8xf32, #tpu.memory_space<vmem>>, vector<1x8xf32>
    %29 = vector.broadcast %28 : vector<1x8xf32> to vector<16x8xf32>
    %30 = arith.addf %27, %29 : vector<16x8xf32>
    %31 = arith.negf %30 : vector<16x8xf32>
    %32 = math.exp %31 : vector<16x8xf32>
    %cst_19 = arith.constant 1.000000e+00 : f32
    %33 = vector.broadcast %cst_19 : f32 to vector<16x8xf32>
    %34 = arith.addf %33, %32 : vector<16x8xf32>
    %35 = arith.divf %33, %34 : vector<16x8xf32>
    %36 = arith.truncf %35 : vector<16x8xf32> to vector<16x8xbf16>
    %cst_20 = arith.constant dense<0.000000e+00> : vector<16x128xf32>
    %37 = tpu.matmul %36, %9, %cst_20 {dimension_numbers = #tpu.dot_dimension_numbers<[1], [0], [0], [1], [0, 0, 1, 1], [], []>} : vector<16x8xbf16>, vector<8x128xbf16>, vector<16x128xf32> -> vector<16x128xf32>
    %38 = arith.mulf %26, %37 : vector<16x128xf32>
    %39 = arith.truncf %38 : vector<16x128xf32> to vector<16x128xbf16>
    %c0_21 = arith.constant 0 : index
    %c0_22 = arith.constant 0 : index
    %40 = vector.load %arg9[%c0_21, %c0_22] : memref<128x128xbf16, #tpu.memory_space<vmem>>, vector<128x128xbf16>
    %cst_23 = arith.constant dense<0.000000e+00> : vector<16x128xf32>
    %41 = tpu.matmul %39, %40, %cst_23 {dimension_numbers = #tpu.dot_dimension_numbers<[1], [0], [0], [1], [0, 0, 1, 1], [], []>} : vector<16x128xbf16>, vector<128x128xbf16>, vector<16x128xf32> -> vector<16x128xf32>
    %42 = arith.truncf %41 : vector<16x128xf32> to vector<16x128xbf16>
    %c0_24 = arith.constant 0 : index
    %c0_25 = arith.constant 0 : index
    %43 = vector.load %arg10[%c0_24, %c0_25] : memref<16x128xbf16, #tpu.memory_space<vmem>>, vector<16x128xbf16>
    tpu.vector_store %arg10[%c0_24, %c0_25], %42 {strides = array<i32>} : memref<16x128xbf16, #tpu.memory_space<vmem>>, vector<16x128xbf16>,
    return
  }
  func.func @transform_0(%arg0: i32) -> (i32, i32) {
    %c0_i32 = arith.constant 0 : i32
    %c0_i32_0 = arith.constant 0 : i32
    return %arg0, %c0_i32 : i32, i32
  }
  func.func @transform_1(%arg0: i32) -> (i32, i32) {
    %c0_i32 = arith.constant 0 : i32
    %c0_i32_0 = arith.constant 0 : i32
    return %arg0, %c0_i32 : i32, i32
  }
  func.func @transform_2(%arg0: i32) -> (i32, i32) {
    %c0_i32 = arith.constant 0 : i32
    %c0_i32_0 = arith.constant 0 : i32
    %c0_i32_1 = arith.constant 0 : i32
    return %c0_i32, %c0_i32_0 : i32, i32
  }
  func.func @transform_3(%arg0: i32) -> (i32, i32) {
    %c0_i32 = arith.constant 0 : i32
    %c0_i32_0 = arith.constant 0 : i32
    %c0_i32_1 = arith.constant 0 : i32
    return %c0_i32, %c0_i32_0 : i32, i32
  }
  func.func @transform_4(%arg0: i32) -> (i32, i32) {
    %c0_i32 = arith.constant 0 : i32
    %c0_i32_0 = arith.constant 0 : i32
    %c0_i32_1 = arith.constant 0 : i32
    return %c0_i32, %c0_i32_0 : i32, i32
  }
  func.func @transform_5(%arg0: i32) -> (i32, i32) {
    %c0_i32 = arith.constant 0 : i32
    %c0_i32_0 = arith.constant 0 : i32
    %c0_i32_1 = arith.constant 0 : i32
    return %c0_i32, %c0_i32_0 : i32, i32
  }
  func.func @transform_6(%arg0: i32) -> (i32, i32) {
    %c0_i32 = arith.constant 0 : i32
    %c0_i32_0 = arith.constant 0 : i32
    %c0_i32_1 = arith.constant 0 : i32
    return %c0_i32, %c0_i32_0 : i32, i32
  }
  func.func @transform_7(%arg0: i32) -> (i32, i32) {
    %c0_i32 = arith.constant 0 : i32
    %c0_i32_0 = arith.constant 0 : i32
    %c0_i32_1 = arith.constant 0 : i32
    return %c0_i32, %c0_i32_0 : i32, i32
  }
  func.func @transform_8(%arg0: i32) -> (i32, i32) {
    %c0_i32 = arith.constant 0 : i32
    %c0_i32_0 = arith.constant 0 : i32
    %c0_i32_1 = arith.constant 0 : i32
    return %c0_i32, %c0_i32_0 : i32, i32
  }
  func.func @transform_9(%arg0: i32) -> (i32, i32) {
    %c0_i32 = arith.constant 0 : i32
    %c0_i32_0 = arith.constant 0 : i32
    return %arg0, %c0_i32 : i32, i32
  }
}

module attributes {stable_mosaic.version = 11 : i64} {
  func.func @kernel(%arg0: i32, %arg1: memref<8x64xf32, #tpu.memory_space<vmem>>, %arg2: memref<8x128xf32, #tpu.memory_space<vmem>>, %arg3: memref<64x136xbf16, #tpu.memory_space<vmem>>, %arg4: memref<128x136xbf16, #tpu.memory_space<vmem>>, %arg5: memref<8x128xbf16, #tpu.memory_space<vmem>>, %arg6: memref<1x8xf32, #tpu.memory_space<vmem>>, %arg7: memref<128x136xbf16, #tpu.memory_space<vmem>>, %arg8: memref<1x8xf32, #tpu.memory_space<vmem>>, %arg9: memref<128x128xbf16, #tpu.memory_space<vmem>>, %arg10: memref<8x128xf32, #tpu.memory_space<vmem>>) attributes {dimension_semantics = [#tpu.dimension_semantics<parallel>], iteration_bounds = array<i64: 1>, scalar_prefetch = 0 : i64, scratch_operands = 0 : i64, tpu.core_type = #tpu.core_type<tc>, window_params = [{transform_indices = @transform_0, window_bounds = array<i64: 8, 64>}, {transform_indices = @transform_1, window_bounds = array<i64: 8, 128>}, {pipeline_mode = #tpu.pipeline_mode<synchronous>, transform_indices = @transform_2, window_bounds = array<i64: 64, 136>}, {pipeline_mode = #tpu.pipeline_mode<synchronous>, transform_indices = @transform_3, window_bounds = array<i64: 128, 136>}, {pipeline_mode = #tpu.pipeline_mode<synchronous>, transform_indices = @transform_4, window_bounds = array<i64: 8, 128>}, {pipeline_mode = #tpu.pipeline_mode<synchronous>, transform_indices = @transform_5, window_bounds = array<i64: 1, 8>}, {pipeline_mode = #tpu.pipeline_mode<synchronous>, transform_indices = @transform_6, window_bounds = array<i64: 128, 136>}, {pipeline_mode = #tpu.pipeline_mode<synchronous>, transform_indices = @transform_7, window_bounds = array<i64: 1, 8>}, {pipeline_mode = #tpu.pipeline_mode<synchronous>, transform_indices = @transform_8, window_bounds = array<i64: 128, 128>}, {transform_indices = @transform_9, window_bounds = array<i64: 8, 128>}]} {
    %c0 = arith.constant 0 : index
    %c0_0 = arith.constant 0 : index
    %0 = vector.load %arg1[%c0, %c0_0] : memref<8x64xf32, #tpu.memory_space<vmem>>, vector<8x64xf32>
    %1 = arith.truncf %0 : vector<8x64xf32> to vector<8x64xbf16>
    %c0_1 = arith.constant 0 : index
    %c0_2 = arith.constant 0 : index
    %2 = vector.load %arg2[%c0_1, %c0_2] : memref<8x128xf32, #tpu.memory_space<vmem>>, vector<8x128xf32>
    %3 = arith.truncf %2 : vector<8x128xf32> to vector<8x128xbf16>
    %c0_3 = arith.constant 0 : index
    %c0_4 = arith.constant 0 : index
    %4 = vector.load %arg3[%c0_3, %c0_4] : memref<64x136xbf16, #tpu.memory_space<vmem>>, vector<64x136xbf16>
    %cst = arith.constant dense<0.000000e+00> : vector<8x136xf32>
    %5 = tpu.matmul %1, %4, %cst {dimension_numbers = #tpu.dot_dimension_numbers<[1], [0], [0], [1], [0, 0, 1, 1], [], []>} : vector<8x64xbf16>, vector<64x136xbf16>, vector<8x136xf32> -> vector<8x136xf32>
    %c0_5 = arith.constant 0 : index
    %c0_6 = arith.constant 0 : index
    %6 = vector.load %arg4[%c0_5, %c0_6] : memref<128x136xbf16, #tpu.memory_space<vmem>>, vector<128x136xbf16>
    %cst_7 = arith.constant dense<0.000000e+00> : vector<8x136xf32>
    %7 = tpu.matmul %3, %6, %cst_7 {dimension_numbers = #tpu.dot_dimension_numbers<[1], [0], [0], [1], [0, 0, 1, 1], [], []>} : vector<8x128xbf16>, vector<128x136xbf16>, vector<8x136xf32> -> vector<8x136xf32>
    %8 = arith.addf %5, %7 : vector<8x136xf32>
    %c0_8 = arith.constant 0 : index
    %c0_9 = arith.constant 0 : index
    %9 = vector.load %arg5[%c0_8, %c0_9] : memref<8x128xbf16, #tpu.memory_space<vmem>>, vector<8x128xbf16>
    %10 = vector.extract_strided_slice %8 {offsets = [0, 0], sizes = [8, 128], strides = [1, 1]} : vector<8x136xf32> to vector<8x128xf32>
    %11 = vector.extract_strided_slice %8 {offsets = [0, 128], sizes = [8, 8], strides = [1, 1]} : vector<8x136xf32> to vector<8x8xf32>
    %c0_10 = arith.constant 0 : index
    %c0_11 = arith.constant 0 : index
    %12 = vector.load %arg6[%c0_10, %c0_11] : memref<1x8xf32, #tpu.memory_space<vmem>>, vector<1x8xf32>
    %13 = vector.broadcast %12 : vector<1x8xf32> to vector<8x8xf32>
    %14 = arith.addf %11, %13 : vector<8x8xf32>
    %15 = arith.negf %14 : vector<8x8xf32>
    %16 = math.exp %15 : vector<8x8xf32>
    %cst_12 = arith.constant 1.000000e+00 : f32
    %17 = vector.broadcast %cst_12 : f32 to vector<8x8xf32>
    %18 = arith.addf %17, %16 : vector<8x8xf32>
    %19 = arith.divf %17, %18 : vector<8x8xf32>
    %20 = arith.truncf %19 : vector<8x8xf32> to vector<8x8xbf16>
    %cst_13 = arith.constant dense<0.000000e+00> : vector<8x128xf32>
    %21 = tpu.matmul %20, %9, %cst_13 {dimension_numbers = #tpu.dot_dimension_numbers<[1], [0], [0], [1], [0, 0, 1, 1], [], []>} : vector<8x8xbf16>, vector<8x128xbf16>, vector<8x128xf32> -> vector<8x128xf32>
    %22 = arith.mulf %10, %21 : vector<8x128xf32>
    %23 = arith.truncf %22 : vector<8x128xf32> to vector<8x128xbf16>
    %c0_14 = arith.constant 0 : index
    %c0_15 = arith.constant 0 : index
    %24 = vector.load %arg7[%c0_14, %c0_15] : memref<128x136xbf16, #tpu.memory_space<vmem>>, vector<128x136xbf16>
    %cst_16 = arith.constant dense<0.000000e+00> : vector<8x136xf32>
    %25 = tpu.matmul %23, %24, %cst_16 {dimension_numbers = #tpu.dot_dimension_numbers<[1], [0], [0], [1], [0, 0, 1, 1], [], []>} : vector<8x128xbf16>, vector<128x136xbf16>, vector<8x136xf32> -> vector<8x136xf32>
    %26 = vector.extract_strided_slice %25 {offsets = [0, 0], sizes = [8, 128], strides = [1, 1]} : vector<8x136xf32> to vector<8x128xf32>
    %27 = vector.extract_strided_slice %25 {offsets = [0, 128], sizes = [8, 8], strides = [1, 1]} : vector<8x136xf32> to vector<8x8xf32>
    %c0_17 = arith.constant 0 : index
    %c0_18 = arith.constant 0 : index
    %28 = vector.load %arg8[%c0_17, %c0_18] : memref<1x8xf32, #tpu.memory_space<vmem>>, vector<1x8xf32>
    %29 = vector.broadcast %28 : vector<1x8xf32> to vector<8x8xf32>
    %30 = arith.addf %27, %29 : vector<8x8xf32>
    %31 = arith.negf %30 : vector<8x8xf32>
    %32 = math.exp %31 : vector<8x8xf32>
    %cst_19 = arith.constant 1.000000e+00 : f32
    %33 = vector.broadcast %cst_19 : f32 to vector<8x8xf32>
    %34 = arith.addf %33, %32 : vector<8x8xf32>
    %35 = arith.divf %33, %34 : vector<8x8xf32>
    %36 = arith.truncf %35 : vector<8x8xf32> to vector<8x8xbf16>
    %cst_20 = arith.constant dense<0.000000e+00> : vector<8x128xf32>
    %37 = tpu.matmul %36, %9, %cst_20 {dimension_numbers = #tpu.dot_dimension_numbers<[1], [0], [0], [1], [0, 0, 1, 1], [], []>} : vector<8x8xbf16>, vector<8x128xbf16>, vector<8x128xf32> -> vector<8x128xf32>
    %38 = arith.mulf %26, %37 : vector<8x128xf32>
    %39 = arith.truncf %38 : vector<8x128xf32> to vector<8x128xbf16>
    %c0_21 = arith.constant 0 : index
    %c0_22 = arith.constant 0 : index
    %40 = vector.load %arg9[%c0_21, %c0_22] : memref<128x128xbf16, #tpu.memory_space<vmem>>, vector<128x128xbf16>
    %cst_23 = arith.constant dense<0.000000e+00> : vector<8x128xf32>
    %41 = tpu.matmul %39, %40, %cst_23 {dimension_numbers = #tpu.dot_dimension_numbers<[1], [0], [0], [1], [0, 0, 1, 1], [], []>} : vector<8x128xbf16>, vector<128x128xbf16>, vector<8x128xf32> -> vector<8x128xf32>
    %c0_24 = arith.constant 0 : index
    %c0_25 = arith.constant 0 : index
    %42 = vector.load %arg10[%c0_24, %c0_25] : memref<8x128xf32, #tpu.memory_space<vmem>>, vector<8x128xf32>
    tpu.vector_store %arg10[%c0_24, %c0_25], %41 {strides = array<i32>} : memref<8x128xf32, #tpu.memory_space<vmem>>, vector<8x128xf32>,
    return
  }
  func.func @transform_0(%arg0: i32) -> (i32, i32) {
    %c0_i32 = arith.constant 0 : i32
    %c0_i32_0 = arith.constant 0 : i32
    return %arg0, %c0_i32 : i32, i32
  }
  func.func @transform_1(%arg0: i32) -> (i32, i32) {
    %c0_i32 = arith.constant 0 : i32
    %c0_i32_0 = arith.constant 0 : i32
    return %arg0, %c0_i32 : i32, i32
  }
  func.func @transform_2(%arg0: i32) -> (i32, i32) {
    %c0_i32 = arith.constant 0 : i32
    %c0_i32_0 = arith.constant 0 : i32
    %c0_i32_1 = arith.constant 0 : i32
    return %c0_i32, %c0_i32_0 : i32, i32
  }
  func.func @transform_3(%arg0: i32) -> (i32, i32) {
    %c0_i32 = arith.constant 0 : i32
    %c0_i32_0 = arith.constant 0 : i32
    %c0_i32_1 = arith.constant 0 : i32
    return %c0_i32, %c0_i32_0 : i32, i32
  }
  func.func @transform_4(%arg0: i32) -> (i32, i32) {
    %c0_i32 = arith.constant 0 : i32
    %c0_i32_0 = arith.constant 0 : i32
    %c0_i32_1 = arith.constant 0 : i32
    return %c0_i32, %c0_i32_0 : i32, i32
  }
  func.func @transform_5(%arg0: i32) -> (i32, i32) {
    %c0_i32 = arith.constant 0 : i32
    %c0_i32_0 = arith.constant 0 : i32
    %c0_i32_1 = arith.constant 0 : i32
    return %c0_i32, %c0_i32_0 : i32, i32
  }
  func.func @transform_6(%arg0: i32) -> (i32, i32) {
    %c0_i32 = arith.constant 0 : i32
    %c0_i32_0 = arith.constant 0 : i32
    %c0_i32_1 = arith.constant 0 : i32
    return %c0_i32, %c0_i32_0 : i32, i32
  }
  func.func @transform_7(%arg0: i32) -> (i32, i32) {
    %c0_i32 = arith.constant 0 : i32
    %c0_i32_0 = arith.constant 0 : i32
    %c0_i32_1 = arith.constant 0 : i32
    return %c0_i32, %c0_i32_0 : i32, i32
  }
  func.func @transform_8(%arg0: i32) -> (i32, i32) {
    %c0_i32 = arith.constant 0 : i32
    %c0_i32_0 = arith.constant 0 : i32
    %c0_i32_1 = arith.constant 0 : i32
    return %c0_i32, %c0_i32_0 : i32, i32
  }
  func.func @transform_9(%arg0: i32) -> (i32, i32) {
    %c0_i32 = arith.constant 0 : i32
    %c0_i32_0 = arith.constant 0 : i32
    return %arg0, %c0_i32 : i32, i32
  }
}

module attributes {stable_mosaic.version = 11 : i64} {
  func.func @kernel(%arg0: i32, %arg1: memref<16x128xf32, #tpu.memory_space<vmem>>, %arg2: memref<16x128xf32, #tpu.memory_space<vmem>>, %arg3: memref<128x136xbf16, #tpu.memory_space<vmem>>, %arg4: memref<128x136xbf16, #tpu.memory_space<vmem>>, %arg5: memref<8x128xbf16, #tpu.memory_space<vmem>>, %arg6: memref<1x8xf32, #tpu.memory_space<vmem>>, %arg7: memref<128x136xbf16, #tpu.memory_space<vmem>>, %arg8: memref<1x8xf32, #tpu.memory_space<vmem>>, %arg9: memref<128x128xbf16, #tpu.memory_space<vmem>>, %arg10: memref<16x128xbf16, #tpu.memory_space<vmem>>) attributes {dimension_semantics = [#tpu.dimension_semantics<parallel>], iteration_bounds = array<i64: 1>, scalar_prefetch = 0 : i64, scratch_operands = 0 : i64, tpu.core_type = #tpu.core_type<tc>, window_params = [{transform_indices = @transform_0, window_bounds = array<i64: 16, 128>}, {transform_indices = @transform_1, window_bounds = array<i64: 16, 128>}, {pipeline_mode = #tpu.pipeline_mode<synchronous>, transform_indices = @transform_2, window_bounds = array<i64: 128, 136>}, {pipeline_mode = #tpu.pipeline_mode<synchronous>, transform_indices = @transform_3, window_bounds = array<i64: 128, 136>}, {pipeline_mode = #tpu.pipeline_mode<synchronous>, transform_indices = @transform_4, window_bounds = array<i64: 8, 128>}, {pipeline_mode = #tpu.pipeline_mode<synchronous>, transform_indices = @transform_5, window_bounds = array<i64: 1, 8>}, {pipeline_mode = #tpu.pipeline_mode<synchronous>, transform_indices = @transform_6, window_bounds = array<i64: 128, 136>}, {pipeline_mode = #tpu.pipeline_mode<synchronous>, transform_indices = @transform_7, window_bounds = array<i64: 1, 8>}, {pipeline_mode = #tpu.pipeline_mode<synchronous>, transform_indices = @transform_8, window_bounds = array<i64: 128, 128>}, {transform_indices = @transform_9, window_bounds = array<i64: 16, 128>}]} {
    %c0 = arith.constant 0 : index
    %c0_0 = arith.constant 0 : index
    %0 = vector.load %arg1[%c0, %c0_0] : memref<16x128xf32, #tpu.memory_space<vmem>>, vector<16x128xf32>
    %1 = arith.truncf %0 : vector<16x128xf32> to vector<16x128xbf16>
    %c0_1 = arith.constant 0 : index
    %c0_2 = arith.constant 0 : index
    %2 = vector.load %arg2[%c0_1, %c0_2] : memref<16x128xf32, #tpu.memory_space<vmem>>, vector<16x128xf32>
    %3 = arith.truncf %2 : vector<16x128xf32> to vector<16x128xbf16>
    %c0_3 = arith.constant 0 : index
    %c0_4 = arith.constant 0 : index
    %4 = vector.load %arg3[%c0_3, %c0_4] : memref<128x136xbf16, #tpu.memory_space<vmem>>, vector<128x136xbf16>
    %cst = arith.constant dense<0.000000e+00> : vector<16x136xf32>
    %5 = tpu.matmul %1, %4, %cst {dimension_numbers = #tpu.dot_dimension_numbers<[1], [0], [0], [1], [0, 0, 1, 1], [], []>} : vector<16x128xbf16>, vector<128x136xbf16>, vector<16x136xf32> -> vector<16x136xf32>
    %c0_5 = arith.constant 0 : index
    %c0_6 = arith.constant 0 : index
    %6 = vector.load %arg4[%c0_5, %c0_6] : memref<128x136xbf16, #tpu.memory_space<vmem>>, vector<128x136xbf16>
    %cst_7 = arith.constant dense<0.000000e+00> : vector<16x136xf32>
    %7 = tpu.matmul %3, %6, %cst_7 {dimension_numbers = #tpu.dot_dimension_numbers<[1], [0], [0], [1], [0, 0, 1, 1], [], []>} : vector<16x128xbf16>, vector<128x136xbf16>, vector<16x136xf32> -> vector<16x136xf32>
    %8 = arith.addf %5, %7 : vector<16x136xf32>
    %c0_8 = arith.constant 0 : index
    %c0_9 = arith.constant 0 : index
    %9 = vector.load %arg5[%c0_8, %c0_9] : memref<8x128xbf16, #tpu.memory_space<vmem>>, vector<8x128xbf16>
    %10 = vector.extract_strided_slice %8 {offsets = [0, 0], sizes = [16, 128], strides = [1, 1]} : vector<16x136xf32> to vector<16x128xf32>
    %11 = vector.extract_strided_slice %8 {offsets = [0, 128], sizes = [16, 8], strides = [1, 1]} : vector<16x136xf32> to vector<16x8xf32>
    %c0_10 = arith.constant 0 : index
    %c0_11 = arith.constant 0 : index
    %12 = vector.load %arg6[%c0_10, %c0_11] : memref<1x8xf32, #tpu.memory_space<vmem>>, vector<1x8xf32>
    %13 = vector.broadcast %12 : vector<1x8xf32> to vector<16x8xf32>
    %14 = arith.addf %11, %13 : vector<16x8xf32>
    %15 = arith.negf %14 : vector<16x8xf32>
    %16 = math.exp %15 : vector<16x8xf32>
    %cst_12 = arith.constant 1.000000e+00 : f32
    %17 = vector.broadcast %cst_12 : f32 to vector<16x8xf32>
    %18 = arith.addf %17, %16 : vector<16x8xf32>
    %19 = arith.divf %17, %18 : vector<16x8xf32>
    %20 = arith.truncf %19 : vector<16x8xf32> to vector<16x8xbf16>
    %cst_13 = arith.constant dense<0.000000e+00> : vector<16x128xf32>
    %21 = tpu.matmul %20, %9, %cst_13 {dimension_numbers = #tpu.dot_dimension_numbers<[1], [0], [0], [1], [0, 0, 1, 1], [], []>} : vector<16x8xbf16>, vector<8x128xbf16>, vector<16x128xf32> -> vector<16x128xf32>
    %22 = arith.mulf %10, %21 : vector<16x128xf32>
    %23 = arith.truncf %22 : vector<16x128xf32> to vector<16x128xbf16>
    %c0_14 = arith.constant 0 : index
    %c0_15 = arith.constant 0 : index
    %24 = vector.load %arg7[%c0_14, %c0_15] : memref<128x136xbf16, #tpu.memory_space<vmem>>, vector<128x136xbf16>
    %cst_16 = arith.constant dense<0.000000e+00> : vector<16x136xf32>
    %25 = tpu.matmul %23, %24, %cst_16 {dimension_numbers = #tpu.dot_dimension_numbers<[1], [0], [0], [1], [0, 0, 1, 1], [], []>} : vector<16x128xbf16>, vector<128x136xbf16>, vector<16x136xf32> -> vector<16x136xf32>
    %26 = vector.extract_strided_slice %25 {offsets = [0, 0], sizes = [16, 128], strides = [1, 1]} : vector<16x136xf32> to vector<16x128xf32>
    %27 = vector.extract_strided_slice %25 {offsets = [0, 128], sizes = [16, 8], strides = [1, 1]} : vector<16x136xf32> to vector<16x8xf32>
    %c0_17 = arith.constant 0 : index
    %c0_18 = arith.constant 0 : index
    %28 = vector.load %arg8[%c0_17, %c0_18] : memref<1x8xf32, #tpu.memory_space<vmem>>, vector<1x8xf32>
    %29 = vector.broadcast %28 : vector<1x8xf32> to vector<16x8xf32>
    %30 = arith.addf %27, %29 : vector<16x8xf32>
    %31 = arith.negf %30 : vector<16x8xf32>
    %32 = math.exp %31 : vector<16x8xf32>
    %cst_19 = arith.constant 1.000000e+00 : f32
    %33 = vector.broadcast %cst_19 : f32 to vector<16x8xf32>
    %34 = arith.addf %33, %32 : vector<16x8xf32>
    %35 = arith.divf %33, %34 : vector<16x8xf32>
    %36 = arith.truncf %35 : vector<16x8xf32> to vector<16x8xbf16>
    %cst_20 = arith.constant dense<0.000000e+00> : vector<16x128xf32>
    %37 = tpu.matmul %36, %9, %cst_20 {dimension_numbers = #tpu.dot_dimension_numbers<[1], [0], [0], [1], [0, 0, 1, 1], [], []>} : vector<16x8xbf16>, vector<8x128xbf16>, vector<16x128xf32> -> vector<16x128xf32>
    %38 = arith.mulf %26, %37 : vector<16x128xf32>
    %39 = arith.truncf %38 : vector<16x128xf32> to vector<16x128xbf16>
    %c0_21 = arith.constant 0 : index
    %c0_22 = arith.constant 0 : index
    %40 = vector.load %arg9[%c0_21, %c0_22] : memref<128x128xbf16, #tpu.memory_space<vmem>>, vector<128x128xbf16>
    %cst_23 = arith.constant dense<0.000000e+00> : vector<16x128xf32>
    %41 = tpu.matmul %39, %40, %cst_23 {dimension_numbers = #tpu.dot_dimension_numbers<[1], [0], [0], [1], [0, 0, 1, 1], [], []>} : vector<16x128xbf16>, vector<128x128xbf16>, vector<16x128xf32> -> vector<16x128xf32>
    %42 = arith.truncf %41 : vector<16x128xf32> to vector<16x128xbf16>
    %c0_24 = arith.constant 0 : index
    %c0_25 = arith.constant 0 : index
    %43 = vector.load %arg10[%c0_24, %c0_25] : memref<16x128xbf16, #tpu.memory_space<vmem>>, vector<16x128xbf16>
    tpu.vector_store %arg10[%c0_24, %c0_25], %42 {strides = array<i32>} : memref<16x128xbf16, #tpu.memory_space<vmem>>, vector<16x128xbf16>,
    return
  }
  func.func @transform_0(%arg0: i32) -> (i32, i32) {
    %c0_i32 = arith.constant 0 : i32
    %c0_i32_0 = arith.constant 0 : i32
    return %arg0, %c0_i32 : i32, i32
  }
  func.func @transform_1(%arg0: i32) -> (i32, i32) {
    %c0_i32 = arith.constant 0 : i32
    %c0_i32_0 = arith.constant 0 : i32
    return %arg0, %c0_i32 : i32, i32
  }
  func.func @transform_2(%arg0: i32) -> (i32, i32) {
    %c0_i32 = arith.constant 0 : i32
    %c0_i32_0 = arith.constant 0 : i32
    %c0_i32_1 = arith.constant 0 : i32
    return %c0_i32, %c0_i32_0 : i32, i32
  }
  func.func @transform_3(%arg0: i32) -> (i32, i32) {
    %c0_i32 = arith.constant 0 : i32
    %c0_i32_0 = arith.constant 0 : i32
    %c0_i32_1 = arith.constant 0 : i32
    return %c0_i32, %c0_i32_0 : i32, i32
  }
  func.func @transform_4(%arg0: i32) -> (i32, i32) {
    %c0_i32 = arith.constant 0 : i32
    %c0_i32_0 = arith.constant 0 : i32
    %c0_i32_1 = arith.constant 0 : i32
    return %c0_i32, %c0_i32_0 : i32, i32
  }
  func.func @transform_5(%arg0: i32) -> (i32, i32) {
    %c0_i32 = arith.constant 0 : i32
    %c0_i32_0 = arith.constant 0 : i32
    %c0_i32_1 = arith.constant 0 : i32
    return %c0_i32, %c0_i32_0 : i32, i32
  }
  func.func @transform_6(%arg0: i32) -> (i32, i32) {
    %c0_i32 = arith.constant 0 : i32
    %c0_i32_0 = arith.constant 0 : i32
    %c0_i32_1 = arith.constant 0 : i32
    return %c0_i32, %c0_i32_0 : i32, i32
  }
  func.func @transform_7(%arg0: i32) -> (i32, i32) {
    %c0_i32 = arith.constant 0 : i32
    %c0_i32_0 = arith.constant 0 : i32
    %c0_i32_1 = arith.constant 0 : i32
    return %c0_i32, %c0_i32_0 : i32, i32
  }
  func.func @transform_8(%arg0: i32) -> (i32, i32) {
    %c0_i32 = arith.constant 0 : i32
    %c0_i32_0 = arith.constant 0 : i32
    %c0_i32_1 = arith.constant 0 : i32
    return %c0_i32, %c0_i32_0 : i32, i32
  }
  func.func @transform_9(%arg0: i32) -> (i32, i32) {
    %c0_i32 = arith.constant 0 : i32
    %c0_i32_0 = arith.constant 0 : i32
    return %arg0, %c0_i32 : i32, i32
  }
}

module attributes {stable_mosaic.version = 11 : i64} {
  func.func @kernel(%arg0: i32, %arg1: memref<8x128xf32, #tpu.memory_space<vmem>>, %arg2: memref<8x128xf32, #tpu.memory_space<vmem>>, %arg3: memref<128x136xbf16, #tpu.memory_space<vmem>>, %arg4: memref<128x136xbf16, #tpu.memory_space<vmem>>, %arg5: memref<8x128xbf16, #tpu.memory_space<vmem>>, %arg6: memref<1x8xf32, #tpu.memory_space<vmem>>, %arg7: memref<128x136xbf16, #tpu.memory_space<vmem>>, %arg8: memref<1x8xf32, #tpu.memory_space<vmem>>, %arg9: memref<128x128xbf16, #tpu.memory_space<vmem>>, %arg10: memref<8x128xf32, #tpu.memory_space<vmem>>) attributes {dimension_semantics = [#tpu.dimension_semantics<parallel>], iteration_bounds = array<i64: 1>, scalar_prefetch = 0 : i64, scratch_operands = 0 : i64, tpu.core_type = #tpu.core_type<tc>, window_params = [{transform_indices = @transform_0, window_bounds = array<i64: 8, 128>}, {transform_indices = @transform_1, window_bounds = array<i64: 8, 128>}, {pipeline_mode = #tpu.pipeline_mode<synchronous>, transform_indices = @transform_2, window_bounds = array<i64: 128, 136>}, {pipeline_mode = #tpu.pipeline_mode<synchronous>, transform_indices = @transform_3, window_bounds = array<i64: 128, 136>}, {pipeline_mode = #tpu.pipeline_mode<synchronous>, transform_indices = @transform_4, window_bounds = array<i64: 8, 128>}, {pipeline_mode = #tpu.pipeline_mode<synchronous>, transform_indices = @transform_5, window_bounds = array<i64: 1, 8>}, {pipeline_mode = #tpu.pipeline_mode<synchronous>, transform_indices = @transform_6, window_bounds = array<i64: 128, 136>}, {pipeline_mode = #tpu.pipeline_mode<synchronous>, transform_indices = @transform_7, window_bounds = array<i64: 1, 8>}, {pipeline_mode = #tpu.pipeline_mode<synchronous>, transform_indices = @transform_8, window_bounds = array<i64: 128, 128>}, {transform_indices = @transform_9, window_bounds = array<i64: 8, 128>}]} {
    %c0 = arith.constant 0 : index
    %c0_0 = arith.constant 0 : index
    %0 = vector.load %arg1[%c0, %c0_0] : memref<8x128xf32, #tpu.memory_space<vmem>>, vector<8x128xf32>
    %1 = arith.truncf %0 : vector<8x128xf32> to vector<8x128xbf16>
    %c0_1 = arith.constant 0 : index
    %c0_2 = arith.constant 0 : index
    %2 = vector.load %arg2[%c0_1, %c0_2] : memref<8x128xf32, #tpu.memory_space<vmem>>, vector<8x128xf32>
    %3 = arith.truncf %2 : vector<8x128xf32> to vector<8x128xbf16>
    %c0_3 = arith.constant 0 : index
    %c0_4 = arith.constant 0 : index
    %4 = vector.load %arg3[%c0_3, %c0_4] : memref<128x136xbf16, #tpu.memory_space<vmem>>, vector<128x136xbf16>
    %cst = arith.constant dense<0.000000e+00> : vector<8x136xf32>
    %5 = tpu.matmul %1, %4, %cst {dimension_numbers = #tpu.dot_dimension_numbers<[1], [0], [0], [1], [0, 0, 1, 1], [], []>} : vector<8x128xbf16>, vector<128x136xbf16>, vector<8x136xf32> -> vector<8x136xf32>
    %c0_5 = arith.constant 0 : index
    %c0_6 = arith.constant 0 : index
    %6 = vector.load %arg4[%c0_5, %c0_6] : memref<128x136xbf16, #tpu.memory_space<vmem>>, vector<128x136xbf16>
    %cst_7 = arith.constant dense<0.000000e+00> : vector<8x136xf32>
    %7 = tpu.matmul %3, %6, %cst_7 {dimension_numbers = #tpu.dot_dimension_numbers<[1], [0], [0], [1], [0, 0, 1, 1], [], []>} : vector<8x128xbf16>, vector<128x136xbf16>, vector<8x136xf32> -> vector<8x136xf32>
    %8 = arith.addf %5, %7 : vector<8x136xf32>
    %c0_8 = arith.constant 0 : index
    %c0_9 = arith.constant 0 : index
    %9 = vector.load %arg5[%c0_8, %c0_9] : memref<8x128xbf16, #tpu.memory_space<vmem>>, vector<8x128xbf16>
    %10 = vector.extract_strided_slice %8 {offsets = [0, 0], sizes = [8, 128], strides = [1, 1]} : vector<8x136xf32> to vector<8x128xf32>
    %11 = vector.extract_strided_slice %8 {offsets = [0, 128], sizes = [8, 8], strides = [1, 1]} : vector<8x136xf32> to vector<8x8xf32>
    %c0_10 = arith.constant 0 : index
    %c0_11 = arith.constant 0 : index
    %12 = vector.load %arg6[%c0_10, %c0_11] : memref<1x8xf32, #tpu.memory_space<vmem>>, vector<1x8xf32>
    %13 = vector.broadcast %12 : vector<1x8xf32> to vector<8x8xf32>
    %14 = arith.addf %11, %13 : vector<8x8xf32>
    %15 = arith.negf %14 : vector<8x8xf32>
    %16 = math.exp %15 : vector<8x8xf32>
    %cst_12 = arith.constant 1.000000e+00 : f32
    %17 = vector.broadcast %cst_12 : f32 to vector<8x8xf32>
    %18 = arith.addf %17, %16 : vector<8x8xf32>
    %19 = arith.divf %17, %18 : vector<8x8xf32>
    %20 = arith.truncf %19 : vector<8x8xf32> to vector<8x8xbf16>
    %cst_13 = arith.constant dense<0.000000e+00> : vector<8x128xf32>
    %21 = tpu.matmul %20, %9, %cst_13 {dimension_numbers = #tpu.dot_dimension_numbers<[1], [0], [0], [1], [0, 0, 1, 1], [], []>} : vector<8x8xbf16>, vector<8x128xbf16>, vector<8x128xf32> -> vector<8x128xf32>
    %22 = arith.mulf %10, %21 : vector<8x128xf32>
    %23 = arith.truncf %22 : vector<8x128xf32> to vector<8x128xbf16>
    %c0_14 = arith.constant 0 : index
    %c0_15 = arith.constant 0 : index
    %24 = vector.load %arg7[%c0_14, %c0_15] : memref<128x136xbf16, #tpu.memory_space<vmem>>, vector<128x136xbf16>
    %cst_16 = arith.constant dense<0.000000e+00> : vector<8x136xf32>
    %25 = tpu.matmul %23, %24, %cst_16 {dimension_numbers = #tpu.dot_dimension_numbers<[1], [0], [0], [1], [0, 0, 1, 1], [], []>} : vector<8x128xbf16>, vector<128x136xbf16>, vector<8x136xf32> -> vector<8x136xf32>
    %26 = vector.extract_strided_slice %25 {offsets = [0, 0], sizes = [8, 128], strides = [1, 1]} : vector<8x136xf32> to vector<8x128xf32>
    %27 = vector.extract_strided_slice %25 {offsets = [0, 128], sizes = [8, 8], strides = [1, 1]} : vector<8x136xf32> to vector<8x8xf32>
    %c0_17 = arith.constant 0 : index
    %c0_18 = arith.constant 0 : index
    %28 = vector.load %arg8[%c0_17, %c0_18] : memref<1x8xf32, #tpu.memory_space<vmem>>, vector<1x8xf32>
    %29 = vector.broadcast %28 : vector<1x8xf32> to vector<8x8xf32>
    %30 = arith.addf %27, %29 : vector<8x8xf32>
    %31 = arith.negf %30 : vector<8x8xf32>
    %32 = math.exp %31 : vector<8x8xf32>
    %cst_19 = arith.constant 1.000000e+00 : f32
    %33 = vector.broadcast %cst_19 : f32 to vector<8x8xf32>
    %34 = arith.addf %33, %32 : vector<8x8xf32>
    %35 = arith.divf %33, %34 : vector<8x8xf32>
    %36 = arith.truncf %35 : vector<8x8xf32> to vector<8x8xbf16>
    %cst_20 = arith.constant dense<0.000000e+00> : vector<8x128xf32>
    %37 = tpu.matmul %36, %9, %cst_20 {dimension_numbers = #tpu.dot_dimension_numbers<[1], [0], [0], [1], [0, 0, 1, 1], [], []>} : vector<8x8xbf16>, vector<8x128xbf16>, vector<8x128xf32> -> vector<8x128xf32>
    %38 = arith.mulf %26, %37 : vector<8x128xf32>
    %39 = arith.truncf %38 : vector<8x128xf32> to vector<8x128xbf16>
    %c0_21 = arith.constant 0 : index
    %c0_22 = arith.constant 0 : index
    %40 = vector.load %arg9[%c0_21, %c0_22] : memref<128x128xbf16, #tpu.memory_space<vmem>>, vector<128x128xbf16>
    %cst_23 = arith.constant dense<0.000000e+00> : vector<8x128xf32>
    %41 = tpu.matmul %39, %40, %cst_23 {dimension_numbers = #tpu.dot_dimension_numbers<[1], [0], [0], [1], [0, 0, 1, 1], [], []>} : vector<8x128xbf16>, vector<128x128xbf16>, vector<8x128xf32> -> vector<8x128xf32>
    %c0_24 = arith.constant 0 : index
    %c0_25 = arith.constant 0 : index
    %42 = vector.load %arg10[%c0_24, %c0_25] : memref<8x128xf32, #tpu.memory_space<vmem>>, vector<8x128xf32>
    tpu.vector_store %arg10[%c0_24, %c0_25], %41 {strides = array<i32>} : memref<8x128xf32, #tpu.memory_space<vmem>>, vector<8x128xf32>,
    return
  }
  func.func @transform_0(%arg0: i32) -> (i32, i32) {
    %c0_i32 = arith.constant 0 : i32
    %c0_i32_0 = arith.constant 0 : i32
    return %arg0, %c0_i32 : i32, i32
  }
  func.func @transform_1(%arg0: i32) -> (i32, i32) {
    %c0_i32 = arith.constant 0 : i32
    %c0_i32_0 = arith.constant 0 : i32
    return %arg0, %c0_i32 : i32, i32
  }
  func.func @transform_2(%arg0: i32) -> (i32, i32) {
    %c0_i32 = arith.constant 0 : i32
    %c0_i32_0 = arith.constant 0 : i32
    %c0_i32_1 = arith.constant 0 : i32
    return %c0_i32, %c0_i32_0 : i32, i32
  }
  func.func @transform_3(%arg0: i32) -> (i32, i32) {
    %c0_i32 = arith.constant 0 : i32
    %c0_i32_0 = arith.constant 0 : i32
    %c0_i32_1 = arith.constant 0 : i32
    return %c0_i32, %c0_i32_0 : i32, i32
  }
  func.func @transform_4(%arg0: i32) -> (i32, i32) {
    %c0_i32 = arith.constant 0 : i32
    %c0_i32_0 = arith.constant 0 : i32
    %c0_i32_1 = arith.constant 0 : i32
    return %c0_i32, %c0_i32_0 : i32, i32
  }
  func.func @transform_5(%arg0: i32) -> (i32, i32) {
    %c0_i32 = arith.constant 0 : i32
    %c0_i32_0 = arith.constant 0 : i32
    %c0_i32_1 = arith.constant 0 : i32
    return %c0_i32, %c0_i32_0 : i32, i32
  }
  func.func @transform_6(%arg0: i32) -> (i32, i32) {
    %c0_i32 = arith.constant 0 : i32
    %c0_i32_0 = arith.constant 0 : i32
    %c0_i32_1 = arith.constant 0 : i32
    return %c0_i32, %c0_i32_0 : i32, i32
  }
  func.func @transform_7(%arg0: i32) -> (i32, i32) {
    %c0_i32 = arith.constant 0 : i32
    %c0_i32_0 = arith.constant 0 : i32
    %c0_i32_1 = arith.constant 0 : i32
    return %c0_i32, %c0_i32_0 : i32, i32
  }
  func.func @transform_8(%arg0: i32) -> (i32, i32) {
    %c0_i32 = arith.constant 0 : i32
    %c0_i32_0 = arith.constant 0 : i32
    %c0_i32_1 = arith.constant 0 : i32
    return %c0_i32, %c0_i32_0 : i32, i32
  }
  func.func @transform_9(%arg0: i32) -> (i32, i32) {
    %c0_i32 = arith.constant 0 : i32
    %c0_i32_0 = arith.constant 0 : i32
    return %arg0, %c0_i32 : i32, i32
  }
}

</mosaic_0001>

<bundles_post_ra>
// kernel: _lambda_.6
= control target key start
LH: loop header
LB: loop body
LE: loop exit
PB: predicated region body
PF: predicated region fallthrough
CT: control target
= control target key end

     0   :  { %v813_v1 = vmov 0   ;;  %vm95_vm0 = vcmask 523264   ;;  %vm255_vm1 = vcmask 1043456   ;;  %v814_v23 = vmov 0.0   ;;  %s1030_s3 = inlined_call_operand.vmem [shape: bf16[64,136], index: 3, kind: input, shape index: {}]   ;;  %s1031_s2 = inlined_call_operand.vmem [shape: bf16[64,136], index: 2, kind: input, shape index: {}]   ;;  %s1032_s1 = inlined_call_operand.vmem [shape: f32[16,64], index: 1, kind: input, shape index: {}]   ;;  %s1033_s0 = inlined_call_operand.vmem [shape: f32[16,64], index: 0, kind: input, shape index: {}]   ;;  %s1034_s4 = inlined_call_operand.vmem [shape: bf16[8,128], index: 4, kind: input, shape index: {}]   ;;  %s1035_s6 = inlined_call_operand.vmem [shape: bf16[128,136], index: 6, kind: input, shape index: {}]   ;;  %s1036_s5 = inlined_call_operand.vmem [shape: f32[1,8], index: 5, kind: input, shape index: {}]   ;;  %s1037_s8 = inlined_call_operand.vmem [shape: bf16[128,128], index: 8, kind: input, shape index: {}]   ;;  %s1038_s7 = inlined_call_operand.vmem [shape: f32[1,8], index: 7, kind: input, shape index: {}]   ;;  %s1039_s9 = inlined_call_operand.vmem [shape: bf16[16,128], index: 9, kind: output, shape index: {}]  }
   0x1   :  { %v741_v0 = vld [vmem:[%s1030_s3 + $0x4] ss:$8 sps:$4 sm:$0xff]   ;;  %131 = vmatprep.mubr.bf16.mxu0 %v813_v1  ;;  %431 = vmatprep.mubr.bf16.mxu1 %v813_v1  ;;  %v743_v2 = vld [vmem:[%s1030_s3] ss:$8 sps:$4 sm:$0xff]   ;;  %v744_v3 = vld [vmem:[%s1030_s3 + $0x14] ss:$8 sps:$4 sm:$0xff]  }
   0x2   :  { %99 = vmatprep.subr.bf16.mxu0 %v741_v0  ;;  %v746_v4 = vld [vmem:[%s1030_s3 + $0x10] ss:$8 sps:$4 sm:$0xff]   ;;  %v747_v5 = vld [vmem:[%s1030_s3 + $0x24] ss:$8 sps:$4 sm:$0xff]   ;;  %v749_v6 = vld [vmem:[%s1030_s3 + $0x20] ss:$8 sps:$4 sm:$0xff]  }
   0x3   :  { %100 = vmatpush1.bf16.msra.mxu0 %v743_v2  ;;  %v750_v7 = vld [vmem:[%s1030_s3 + $0x34] ss:$8 sps:$4 sm:$0xff]   ;;  %v752_v8 = vld [vmem:[%s1030_s3 + $0x30] ss:$8 sps:$4 sm:$0xff]   ;;  %v36_v9 = vld [vmem:[%s1032_s1] sm:$0xff]  ;;  %vm815_vm2 = vmmov 0  }
   0x4   :  { %101 = vmatprep.subr.bf16.mxu0 %v744_v3  ;;  %v37_v10 = vld [vmem:[%s1032_s1 + $0x8] sm:$0xff]  ;;  %v758_v14 = vld [vmem:[%s1031_s2 + $0x14] ss:$8 sps:$4 sm:$0xff]   ;;  %v756_v15 = vld [vmem:[%s1031_s2 + $0x10] ss:$8 sps:$4 sm:$0xff]   ;;  %vm251_vm3 = vcmask 64512  }
   0x5   :  { %v755_v11 = vld [vmem:[%s1031_s2 + $0x4] ss:$8 sps:$4 sm:$0xff]   ;;  %v38_v12 = vpack.c.bf16 %v37_v10, %v36_v9  ;;  %v753_v13 = vld [vmem:[%s1031_s2] ss:$8 sps:$4 sm:$0xff]   ;;  %v764_v18 = vld [vmem:[%s1031_s2 + $0x34] ss:$8 sps:$4 sm:$0xff]  }
   0x6   :  { %v761_v16 = vld [vmem:[%s1031_s2 + $0x24] ss:$8 sps:$4 sm:$0xff]   ;;  %v759_v17 = vld [vmem:[%s1031_s2 + $0x20] ss:$8 sps:$4 sm:$0xff]   ;;  %v762_v19 = vld [vmem:[%s1031_s2 + $0x30] ss:$8 sps:$4 sm:$0xff]  }
   0x7   :  { %102 = vmatpush1.bf16.msra.mxu0 %v746_v4  ;;  %v33_v20 = vld [vmem:[%s1033_s0] sm:$0xff]  ;;  %v34_v21 = vld [vmem:[%s1033_s0 + $0x8] sm:$0xff]  ;;  %v768_v28 = vld [vmem:[%s1035_s6 + $0x14] ss:$8 sps:$4 sm:$0xff]  }
   0x8   :  { %103 = vmatprep.subr.bf16.mxu0 %v747_v5  ;;  %v35_v22 = vpack.c.bf16 %v34_v21, %v33_v20  ;;  %v228_v24 = vld [vmem:[%s1034_s4] sm:$0xf]  ;;  %v765_v26 = vld [vmem:[%s1035_s6 + $0x4] ss:$8 sps:$4 sm:$0xff]   ;;  %v770_v29 = vld [vmem:[%s1035_s6 + $0x10] ss:$8 sps:$4 sm:$0xff]  }
   0x9   :  { %v257_v25 = vsel %vm255_vm1, %v228_v24, 0  ;;  %v767_v27 = vld [vmem:[%s1035_s6] ss:$8 sps:$4 sm:$0xff]   ;;  %399 = vmatprep.subr.bf16.mxu1 %v765_v26  ;;  %v771_v30 = vld [vmem:[%s1035_s6 + $0x24] ss:$8 sps:$4 sm:$0xff]   ;;  %v791_v3 = vld [vmem:[%s1037_s8 + $0x10] sm:$0xff]  }
   0xa   :  { %400 = vmatpush1.bf16.msra.mxu1 %v767_v27  ;;  %v773_v31 = vld [vmem:[%s1035_s6 + $0x20] ss:$8 sps:$4 sm:$0xff]   ;;  %v774_v32 = vld [vmem:[%s1035_s6 + $0x34] ss:$8 sps:$4 sm:$0xff]   ;;  %v776_v33 = vld [vmem:[%s1035_s6 + $0x30] ss:$8 sps:$4 sm:$0xff]  }
   0xb   :  { %104 = vmatpush1.bf16.msra.mxu0 %v749_v6  ;;  %401 = vmatprep.subr.bf16.mxu1 %v768_v28  ;;  %v777_v34 = vld [vmem:[%s1035_s6 + $0x44] ss:$8 sps:$4 sm:$0xff]   ;;  %v779_v35 = vld [vmem:[%s1035_s6 + $0x40] ss:$8 sps:$4 sm:$0xff]   ;;  %v780_v36 = vld [vmem:[%s1035_s6 + $0x54] ss:$8 sps:$4 sm:$0xff]  }
   0xc   :  { %105 = vmatprep.subr.bf16.mxu0 %v750_v7  ;;  %v782_v37 = vld [vmem:[%s1035_s6 + $0x50] ss:$8 sps:$4 sm:$0xff]   ;;  %v783_v38 = vld [vmem:[%s1035_s6 + $0x64] ss:$8 sps:$4 sm:$0xff]   ;;  %v648_v39 = vld [vmem:[%s1036_s5] ss:$0 sm:$0xff] }
   0xd   :  { %v785_v55 = vld [vmem:[%s1035_s6 + $0x60] ss:$8 sps:$4 sm:$0xff]   ;;  %v786_v56 = vld [vmem:[%s1035_s6 + $0x74] ss:$8 sps:$4 sm:$0xff]   ;;  %v788_v57 = vld [vmem:[%s1035_s6 + $0x70] ss:$8 sps:$4 sm:$0xff]  }
   0xe   :  { %402 = vmatpush1.bf16.msra.mxu1 %v770_v29  ;;  %v790_v2 = vld [vmem:[%s1037_s8 + $0x8] sm:$0xff]   ;;  %v792_v4 = vld [vmem:[%s1037_s8 + $0x18] sm:$0xff]   ;;  %v793_v5 = vld [vmem:[%s1037_s8 + $0x20] sm:$0xff]  }
   0xf   :  { %106 = vmatpush1.bf16.msra.mxu0 %v752_v8  ;;  %403 = vmatprep.subr.bf16.mxu1 %v771_v30  ;;  %v794_v6 = vld [vmem:[%s1037_s8 + $0x28] sm:$0xff]   ;;  %v668_v7 = vld [vmem:[%s1038_s7] ss:$0 sm:$0xff]  ;;  %v795_v24 = vld [vmem:[%s1037_s8 + $0x30] sm:$0xff]  }
  0x10   :  { %185 = vmatprep.subr.bf16.mxu0 %v755_v11 }
  0x12   :  { %638 = vmatmul.mubr.msk.bf16.vlgmr.msra.gmra.mrb[0].mxu0 %vm95_vm0, %v38_v12  ;;  %404 = vmatpush1.bf16.msra.mxu1 %v773_v31 }
  0x13   :  { %186 = vmatpush1.bf16.msra.mxu0 %v753_v13  ;;  %217 = vmatprep.mubr.bf16.mxu0 %v813_v1  ;;  %v789_v1 = vld [vmem:[%s1037_s8] sm:$0xff]  }
  0x14   :  { %187 = vmatprep.subr.bf16.mxu0 %v758_v14  ;;  %405 = vmatprep.subr.bf16.mxu1 %v774_v32 }
  0x16   :  { %406 = vmatpush1.bf16.msra.mxu1 %v776_v33 }
  0x17   :  { %188 = vmatpush1.bf16.msra.mxu0 %v756_v15  ;;  %407 = vmatprep.subr.bf16.mxu1 %v777_v34 }
  0x18   :  { %189 = vmatprep.subr.bf16.mxu0 %v761_v16 }
  0x1a   :  { %408 = vmatpush1.bf16.msra.mxu1 %v779_v35 }
  0x1b   :  { %190 = vmatpush1.bf16.msra.mxu0 %v759_v17  ;;  %409 = vmatprep.subr.bf16.mxu1 %v780_v36 }
  0x1c   :  { %191 = vmatprep.subr.bf16.mxu0 %v764_v18 }
  0x1e   :  { %410 = vmatpush1.bf16.msra.mxu1 %v782_v37 }
  0x1f   :  { %192 = vmatpush1.bf16.msra.mxu0 %v762_v19  ;;  %411 = vmatprep.subr.bf16.mxu1 %v783_v38 }
  0x20   :  { %702 = vmatprep.subr.bf16.mxu0 %v814_v23 }
  0x22   :  { %647 = vmatmul.mubr.msk.bf16.vlgmr.msra.gmra.mrb[0].mxu0 %vm95_vm0, %v35_v22  ;;  %412 = vmatpush1.bf16.msra.mxu1 %v785_v55 }
  0x23   :  { %704 = vmatprep.mubr.msk.bf16.mxu0 %vm815_vm2, %v814_v23  ;;  %703 = vmatpush3.bf16.msra.mxu0 %v257_v25 }
  0x24   :  { %708 = vmatprep.subr.bf16.mxu0 %v814_v23  ;;  %413 = vmatprep.subr.bf16.mxu1 %v786_v56 }
  0x26   :  { %414 = vmatpush1.bf16.msra.mxu1 %v788_v57 }
  0x27   :  { %714 = vmatprep.subr.bf16.mxu1 %v814_v23 }
  0xf5   :  { %v219_v40 = vpop.f32.mrb[0].mxu0 }
  0xf6   :  { %v221_v41 = vpop.f32.mrb[1].mxu0 }
  0xf7   :  { %v236_v42 = vadd.f32 %v648_v39, %v221_v41  ;;  %v223_v43 = vpop.f32.mrb[2].mxu0 }
  0xf8   :  { %v225_v44 = vpop.f32.mrb[3].mxu0 }
  0xf9   :  { %v649_v45 = vmul.f32 -1.442695, %v236_v42  ;;  %v237_v46 = vadd.f32 %v648_v39, %v225_v44 }
  0xfb   :  { %797 = vpow2.f32 %v649_v45  ;;  %v650_v47 = vmul.f32 -1.442695, %v237_v46 }
  0xfd   :  { %799 = vpow2.f32 %v650_v47 }
 0x105   :  { %v798_v48 = vpop.eup %797 }
 0x106   :  { %v244_v49 = vadd.f32 1.0, %v798_v48 }
 0x107   :  { %v800_v50 = vpop.eup %799 }
 0x108   :  { %v245_v51 = vadd.f32 1.0, %v800_v50  ;;  %801 = vrcp.f32 %v244_v49 }
 0x10a   :  { %803 = vrcp.f32 %v245_v51 }
 0x112   :  { %v802_v52 = vpop.eup %801 }
 0x114   :  { %v804_v53 = vpop.eup %803 }
 0x115   :  { %v250_v54 = vpack.c.bf16 %v804_v53, %v802_v52 }
 0x117   :  { %705 = vmatmul.mubr.msk.bf16.vlgmr.msra.gmra.mrb[4].mxu0 %vm251_vm3, %v250_v54 }
 0x118   :  { %709 = vmatpush3.bf16.msra.mxu0 %v257_v25  ;;  %710 = vmatprep.mubr.msk.bf16.mxu0 %vm815_vm2, %v814_v23  ;;  %v796_v25 = vld [vmem:[%s1037_s8 + $0x38] sm:$0xff]  }
 0x1ea   :  { %v293_v58 = vpop.f32.mrb[4].mxu0 }
 0x1eb   :  { %v300_v59 = vmul.f32 %v293_v58, %v219_v40  ;;  %v706_v60 = vpop.f32.mrb[5].mxu0 }
 0x1ec   :  { %v296_v61 = vpop.f32.mrb[6].mxu0 }
 0x1ed   :  { %v301_v62 = vmul.f32 %v296_v61, %v223_v43  ;;  %v707_v63 = vpop.f32.mrb[7].mxu0 }
 0x1ef   :  { %v302_v0 = vpack.c.bf16 %v301_v62, %v300_v59 }
 0x1f1   :  { %432 = vmatmul.mubr.bf16.vlgmr.msra.gmra.mrb[0].mxu1 %v302_v0 }
 0x1f2   :  { %730 = vmatprep.mubr.msk.bf16.mxu1 %vm815_vm2, %v814_v23  ;;  %715 = vmatpush3.bf16.msra.mxu1 %v789_v1 }
 0x1f3   :  { %716 = vmatprep.subr.bf16.mxu1 %v814_v23 }
 0x1f6   :  { %717 = vmatpush3.bf16.msra.mxu1 %v790_v2 }
 0x1f7   :  { %718 = vmatprep.subr.bf16.mxu1 %v814_v23 }
 0x1fa   :  { %719 = vmatpush3.bf16.msra.mxu1 %v791_v3 }
 0x1fb   :  { %720 = vmatprep.subr.bf16.mxu1 %v814_v23 }
 0x1fe   :  { %721 = vmatpush3.bf16.msra.mxu1 %v792_v4 }
 0x1ff   :  { %722 = vmatprep.subr.bf16.mxu1 %v814_v23 }
 0x202   :  { %723 = vmatpush3.bf16.msra.mxu1 %v793_v5 }
 0x203   :  { %724 = vmatprep.subr.bf16.mxu1 %v814_v23 }
 0x206   :  { %725 = vmatpush3.bf16.msra.mxu1 %v794_v6 }
 0x207   :  { %726 = vmatprep.subr.bf16.mxu1 %v814_v23 }
 0x20a   :  { %727 = vmatpush3.bf16.msra.mxu1 %v795_v24 }
 0x20b   :  { %728 = vmatprep.subr.bf16.mxu1 %v814_v23 }
 0x20e   :  { %729 = vmatpush3.bf16.msra.mxu1 %v796_v25 }
 0x2c4   :  { %v433_v8 = vpop.f32.mrb[0].mxu1 }
 0x2c5   :  { %v435_v9 = vpop.f32.mrb[1].mxu1 }
 0x2c6   :  { %v449_v10 = vadd.f32 %v668_v7, %v435_v9  ;;  %v437_v11 = vpop.f32.mrb[2].mxu1 }
 0x2c7   :  { %v439_v12 = vpop.f32.mrb[3].mxu1 }
 0x2c8   :  { %v669_v13 = vmul.f32 -1.442695, %v449_v10  ;;  %v450_v14 = vadd.f32 %v668_v7, %v439_v12 }
 0x2ca   :  { %805 = vpow2.f32 %v669_v13  ;;  %v670_v15 = vmul.f32 -1.442695, %v450_v14 }
 0x2cc   :  { %807 = vpow2.f32 %v670_v15 }
 0x2d4   :  { %v806_v16 = vpop.eup %805 }
 0x2d5   :  { %v457_v17 = vadd.f32 1.0, %v806_v16 }
 0x2d6   :  { %v808_v18 = vpop.eup %807 }
 0x2d7   :  { %v458_v19 = vadd.f32 1.0, %v808_v18  ;;  %809 = vrcp.f32 %v457_v17 }
 0x2d9   :  { %811 = vrcp.f32 %v458_v19 }
 0x2e1   :  { %v810_v20 = vpop.eup %809 }
 0x2e3   :  { %v812_v21 = vpop.eup %811 }
 0x2e4   :  { %v463_v22 = vpack.c.bf16 %v812_v21, %v810_v20 }
 0x2e6   :  { %711 = vmatmul.mubr.msk.bf16.vlgmr.msra.gmra.mrb[8].mxu0 %vm251_vm3, %v463_v22 }
 0x3b9   :  { %v501_v26 = vpop.f32.mrb[8].mxu0 }
 0x3ba   :  { %v508_v27 = vmul.f32 %v501_v26, %v433_v8  ;;  %v712_v28 = vpop.f32.mrb[9].mxu0 }
 0x3bb   :  { %v504_v29 = vpop.f32.mrb[10].mxu0 }
 0x3bc   :  { %v509_v30 = vmul.f32 %v504_v29, %v437_v11  ;;  %v713_v31 = vpop.f32.mrb[11].mxu0 }
 0x3be   :  { %v510_v32 = vpack.c.bf16 %v509_v30, %v508_v27 }
 0x3c0   :  { %731 = vmatmul.mubr.bf16.vlgmr.msra.gmra.mrb[4].mxu1 %v510_v32 }
 0x493   :  { %v609_v33 = vpop.f32.mrb[4].mxu1 }
 0x494   :  { %v732_v34 = vpop.f32.mrb[5].mxu1 }
 0x495   :  { %v612_v35 = vpop.f32.mrb[6].mxu1 }
 0x496   :  { %v687_v36 = vpack.c.bf16 %v612_v35, %v609_v33  ;;  %v733_v37 = vpop.f32.mrb[7].mxu1 }
 0x498   :  { %688 = vst [vmem:[%s1039_s9] sm:$0xff] %v687_v36  }

// kernel: _lambda_.7
= control target key start
LH: loop header
LB: loop body
LE: loop exit
PB: predicated region body
PF: predicated region fallthrough
CT: control target
= control target key end

     0   :  { %v818_v1 = vmov 0   ;;  %vm222_vm0 = vcmask 523264   ;;  %vm287_vm1 = vcmask 1043456   ;;  %v819_v30 = vmov 0.0   ;;  %s1058_s3 = inlined_call_operand.vmem [shape: bf16[128,136], index: 3, kind: input, shape index: {}]   ;;  %s1059_s2 = inlined_call_operand.vmem [shape: bf16[64,136], index: 2, kind: input, shape index: {}]   ;;  %s1060_s0 = inlined_call_operand.vmem [shape: f32[8,64], index: 0, kind: input, shape index: {}]   ;;  %s1061_s1 = inlined_call_operand.vmem [shape: f32[8,128], index: 1, kind: input, shape index: {}]   ;;  %s1062_s4 = inlined_call_operand.vmem [shape: bf16[8,128], index: 4, kind: input, shape index: {}]   ;;  %s1063_s6 = inlined_call_operand.vmem [shape: bf16[128,136], index: 6, kind: input, shape index: {}]   ;;  %s1064_s5 = inlined_call_operand.vmem [shape: f32[1,8], index: 5, kind: input, shape index: {}]   ;;  %s1065_s8 = inlined_call_operand.vmem [shape: bf16[128,128], index: 8, kind: input, shape index: {}]   ;;  %s1066_s7 = inlined_call_operand.vmem [shape: f32[1,8], index: 7, kind: input, shape index: {}]   ;;  %s1067_s9 = inlined_call_operand.vmem [shape: f32[8,128], index: 9, kind: output, shape index: {}]  }
   0x1   :  { %v742_v0 = vld [vmem:[%s1058_s3 + $0x4] ss:$8 sps:$4 sm:$0xff]   ;;  %258 = vmatprep.mubr.bf16.mxu1 %v818_v1  ;;  %173 = vmatprep.mubr.bf16.mxu0 %v818_v1  ;;  %v744_v2 = vld [vmem:[%s1058_s3] ss:$8 sps:$4 sm:$0xff]   ;;  %v745_v3 = vld [vmem:[%s1058_s3 + $0x14] ss:$8 sps:$4 sm:$0xff]  }
   0x2   :  { %141 = vmatprep.subr.bf16.mxu0 %v742_v0  ;;  %v747_v4 = vld [vmem:[%s1058_s3 + $0x10] ss:$8 sps:$4 sm:$0xff]   ;;  %v748_v5 = vld [vmem:[%s1058_s3 + $0x24] ss:$8 sps:$4 sm:$0xff]   ;;  %v756_v7 = vld [vmem:[%s1059_s2] ss:$8 sps:$4 sm:$0xff]  }
   0x3   :  { %142 = vmatpush1.bf16.msra.mxu0 %v744_v2  ;;  %v754_v6 = vld [vmem:[%s1059_s2 + $0x4] ss:$8 sps:$4 sm:$0xff]   ;;  %v750_v8 = vld [vmem:[%s1058_s3 + $0x20] ss:$8 sps:$4 sm:$0xff]   ;;  %v751_v9 = vld [vmem:[%s1058_s3 + $0x34] ss:$8 sps:$4 sm:$0xff]  }
   0x4   :  { %143 = vmatprep.subr.bf16.mxu0 %v745_v3  ;;  %226 = vmatprep.subr.bf16.mxu1 %v754_v6  ;;  %v760_v10 = vld [vmem:[%s1059_s2 + $0x14] ss:$8 sps:$4 sm:$0xff]   ;;  %v762_v11 = vld [vmem:[%s1059_s2 + $0x10] ss:$8 sps:$4 sm:$0xff]   ;;  %v766_v13 = vld [vmem:[%s1059_s2 + $0x24] ss:$8 sps:$4 sm:$0xff]  }
   0x5   :  { %227 = vmatpush1.bf16.msra.mxu1 %v756_v7  ;;  %v753_v12 = vld [vmem:[%s1058_s3 + $0x30] ss:$8 sps:$4 sm:$0xff]   ;;  %v757_v14 = vld [vmem:[%s1058_s3 + $0x44] ss:$8 sps:$4 sm:$0xff]   ;;  %v768_v15 = vld [vmem:[%s1059_s2 + $0x20] ss:$8 sps:$4 sm:$0xff]  }
   0x6   :  { %228 = vmatprep.subr.bf16.mxu1 %v760_v10  ;;  %v772_v16 = vld [vmem:[%s1059_s2 + $0x34] ss:$8 sps:$4 sm:$0xff]   ;;  %v759_v17 = vld [vmem:[%s1058_s3 + $0x40] ss:$8 sps:$4 sm:$0xff]   ;;  %v774_v19 = vld [vmem:[%s1059_s2 + $0x30] ss:$8 sps:$4 sm:$0xff]  }
   0x7   :  { %144 = vmatpush1.bf16.msra.mxu0 %v747_v4  ;;  %v763_v18 = vld [vmem:[%s1058_s3 + $0x54] ss:$8 sps:$4 sm:$0xff]   ;;  %v33_v20 = vld [vmem:[%s1060_s0] sm:$0xff]  ;;  %v765_v21 = vld [vmem:[%s1058_s3 + $0x50] ss:$8 sps:$4 sm:$0xff]   ;;  %vm820_vm2 = vmmov 0  }
   0x8   :  { %145 = vmatprep.subr.bf16.mxu0 %v748_v5  ;;  %v769_v22 = vld [vmem:[%s1058_s3 + $0x64] ss:$8 sps:$4 sm:$0xff]   ;;  %v34_v23 = vpack.c.bf16 %v33_v20, %v33_v20  ;;  %v771_v24 = vld [vmem:[%s1058_s3 + $0x60] ss:$8 sps:$4 sm:$0xff]   ;;  %v775_v25 = vld [vmem:[%s1058_s3 + $0x74] ss:$8 sps:$4 sm:$0xff]  }
   0x9   :  { %229 = vmatpush1.bf16.msra.mxu1 %v762_v11  ;;  %v777_v26 = vld [vmem:[%s1058_s3 + $0x70] ss:$8 sps:$4 sm:$0xff]   ;;  %v35_v27 = vld [vmem:[%s1061_s1] sm:$0xff]  ;;  %vm283_vm3 = vcmask 64512   ;;  %v783_v51 = vld [vmem:[%s1063_s6 + $0x14] ss:$8 sps:$4 sm:$0xff]  }
   0xa   :  { %230 = vmatprep.subr.bf16.mxu1 %v766_v13  ;;  %v36_v28 = vpack.c.bf16 %v35_v27, %v35_v27  ;;  %v267_v29 = vld [vmem:[%s1062_s4] sm:$0xf]  ;;  %v780_v32 = vld [vmem:[%s1063_s6 + $0x4] ss:$8 sps:$4 sm:$0xff]   ;;  %v781_v52 = vld [vmem:[%s1063_s6 + $0x10] ss:$8 sps:$4 sm:$0xff]  }
   0xb   :  { %146 = vmatpush1.bf16.msra.mxu0 %v750_v8  ;;  %v955_v31 = vsel %vm287_vm1, %v267_v29, 0  ;;  %v664_v40 = vld [vmem:[%s1064_s5] ss:$0 sm:$0xff]  ;;  %v786_v53 = vld [vmem:[%s1063_s6 + $0x24] ss:$8 sps:$4 sm:$0xff]   ;;  %v805_v10 = vld [vmem:[%s1065_s8 + $0x18] sm:$0xff]  }
   0xc   :  { %147 = vmatprep.subr.bf16.mxu0 %v751_v9  ;;  %v778_v49 = vld [vmem:[%s1063_s6] ss:$8 sps:$4 sm:$0xff]   ;;  %v789_v55 = vld [vmem:[%s1063_s6 + $0x34] ss:$8 sps:$4 sm:$0xff]   ;;  %v787_v56 = vld [vmem:[%s1063_s6 + $0x30] ss:$8 sps:$4 sm:$0xff]  }
   0xd   :  { %231 = vmatpush1.bf16.msra.mxu1 %v768_v15  ;;  %v784_v54 = vld [vmem:[%s1063_s6 + $0x20] ss:$8 sps:$4 sm:$0xff]   ;;  %v792_v57 = vld [vmem:[%s1063_s6 + $0x44] ss:$8 sps:$4 sm:$0xff]   ;;  %v795_v59 = vld [vmem:[%s1063_s6 + $0x54] ss:$8 sps:$4 sm:$0xff]  }
   0xe   :  { %232 = vmatprep.subr.bf16.mxu1 %v772_v16  ;;  %v790_v58 = vld [vmem:[%s1063_s6 + $0x40] ss:$8 sps:$4 sm:$0xff]   ;;  %v793_v60 = vld [vmem:[%s1063_s6 + $0x50] ss:$8 sps:$4 sm:$0xff]   ;;  %v798_v61 = vld [vmem:[%s1063_s6 + $0x64] ss:$8 sps:$4 sm:$0xff]  }
   0xf   :  { %148 = vmatpush1.bf16.msra.mxu0 %v753_v12  ;;  %v796_v62 = vld [vmem:[%s1063_s6 + $0x60] ss:$8 sps:$4 sm:$0xff]   ;;  %v801_v63 = vld [vmem:[%s1063_s6 + $0x74] ss:$8 sps:$4 sm:$0xff]   ;;  %v799_v0 = vld [vmem:[%s1063_s6 + $0x70] ss:$8 sps:$4 sm:$0xff]  }
  0x10   :  { %149 = vmatprep.subr.bf16.mxu0 %v757_v14  ;;  %v802_v7 = vld [vmem:[%s1065_s8] sm:$0xff]   ;;  %v803_v8 = vld [vmem:[%s1065_s8 + $0x8] sm:$0xff]   ;;  %v804_v9 = vld [vmem:[%s1065_s8 + $0x10] sm:$0xff]  }
  0x11   :  { %233 = vmatpush1.bf16.msra.mxu1 %v774_v19  ;;  %v806_v11 = vld [vmem:[%s1065_s8 + $0x20] sm:$0xff]   ;;  %v807_v12 = vld [vmem:[%s1065_s8 + $0x28] sm:$0xff]   ;;  %v808_v13 = vld [vmem:[%s1065_s8 + $0x30] sm:$0xff]  }
  0x12   :  { %707 = vmatprep.subr.bf16.mxu1 %v819_v30  ;;  %v683_v14 = vld [vmem:[%s1066_s7] ss:$0 sm:$0xff] }
  0x13   :  { %150 = vmatpush1.bf16.msra.mxu0 %v759_v17 }
  0x14   :  { %151 = vmatprep.subr.bf16.mxu0 %v763_v18  ;;  %663 = vmatmul.mubr.msk.bf16.vlgmr.msra.gmra.mrb[0].mxu1 %vm222_vm0, %v34_v23 }
  0x15   :  { %708 = vmatpush3.bf16.msra.mxu1 %v955_v31  ;;  %709 = vmatprep.mubr.msk.bf16.mxu1 %vm820_vm2, %v819_v30 }
  0x16   :  { %429 = vmatprep.subr.bf16.mxu1 %v780_v32 }
  0x17   :  { %152 = vmatpush1.bf16.msra.mxu0 %v765_v21 }
  0x18   :  { %153 = vmatprep.subr.bf16.mxu0 %v769_v22 }
  0x1b   :  { %154 = vmatpush1.bf16.msra.mxu0 %v771_v24 }
  0x1c   :  { %155 = vmatprep.subr.bf16.mxu0 %v775_v25  ;;  %v809_v25 = vld [vmem:[%s1065_s8 + $0x38] sm:$0xff]  }
  0x1f   :  { %156 = vmatpush1.bf16.msra.mxu0 %v777_v26 }
  0x20   :  { %719 = vmatprep.subr.bf16.mxu0 %v819_v30 }
  0x22   :  { %174 = vmatmul.mubr.bf16.vlgmr.msra.gmra.mrb[0].mxu0 %v36_v28 }
  0x23   :  { %735 = vmatprep.mubr.msk.bf16.mxu0 %vm820_vm2, %v819_v30  ;;  %720 = vmatpush3.bf16.msra.mxu0 %v802_v7 }
  0x24   :  { %721 = vmatprep.subr.bf16.mxu0 %v819_v30 }
  0x27   :  { %722 = vmatpush3.bf16.msra.mxu0 %v803_v8 }
  0x28   :  { %723 = vmatprep.subr.bf16.mxu0 %v819_v30 }
  0x2b   :  { %724 = vmatpush3.bf16.msra.mxu0 %v804_v9 }
  0x2c   :  { %725 = vmatprep.subr.bf16.mxu0 %v819_v30 }
  0x2f   :  { %726 = vmatpush3.bf16.msra.mxu0 %v805_v10 }
  0x30   :  { %727 = vmatprep.subr.bf16.mxu0 %v819_v30 }
  0x33   :  { %728 = vmatpush3.bf16.msra.mxu0 %v806_v11 }
  0x34   :  { %729 = vmatprep.subr.bf16.mxu0 %v819_v30 }
  0x37   :  { %730 = vmatpush3.bf16.msra.mxu0 %v807_v12 }
  0x38   :  { %731 = vmatprep.subr.bf16.mxu0 %v819_v30 }
  0x3b   :  { %732 = vmatpush3.bf16.msra.mxu0 %v808_v13 }
  0x3c   :  { %733 = vmatprep.subr.bf16.mxu0 %v819_v30 }
  0x3f   :  { %734 = vmatpush3.bf16.msra.mxu0 %v809_v25 }
  0xe7   :  { %v260_v33 = vpop.f32.mrb[0].mxu1 }
  0xe8   :  { %v262_v34 = vpop.f32.mrb[1].mxu1 }
  0xe9   :  { %v264_v35 = vpop.f32.mrb[2].mxu1 }
  0xea   :  { %v265_v36 = vpop.f32.mrb[3].mxu1 }
  0xf5   :  { %v175_v37 = vpop.f32.mrb[0].mxu0 }
  0xf6   :  { %v261_v38 = vadd.f32 %v260_v33, %v175_v37  ;;  %v177_v39 = vpop.f32.mrb[1].mxu0 }
  0xf7   :  { %v263_v41 = vadd.f32 %v262_v34, %v177_v39  ;;  %v179_v42 = vpop.f32.mrb[2].mxu0 }
  0xf8   :  { %v180_v43 = vpop.f32.mrb[3].mxu0 }
  0xf9   :  { %v275_v44 = vadd.f32 %v664_v40, %v263_v41 }
  0xfb   :  { %v665_v45 = vmul.f32 -1.442695, %v275_v44 }
  0xfd   :  { %810 = vpow2.f32 %v665_v45 }
 0x107   :  { %v811_v46 = vpop.eup %810 }
 0x108   :  { %v279_v47 = vadd.f32 1.0, %v811_v46 }
 0x10a   :  { %812 = vrcp.f32 %v279_v47 }
 0x114   :  { %v813_v48 = vpop.eup %812 }
 0x115   :  { %v282_v50 = vpack.c.bf16 %v813_v48, %v813_v48 }
 0x117   :  { %710 = vmatmul.mubr.msk.bf16.vlgmr.msra.gmra.mrb[4].mxu1 %vm283_vm3, %v282_v50 }
 0x118   :  { %430 = vmatpush1.bf16.msra.mxu1 %v778_v49  ;;  %461 = vmatprep.mubr.bf16.mxu1 %v818_v1 }
 0x119   :  { %431 = vmatprep.subr.bf16.mxu1 %v783_v51 }
 0x11c   :  { %432 = vmatpush1.bf16.msra.mxu1 %v781_v52 }
 0x11d   :  { %433 = vmatprep.subr.bf16.mxu1 %v786_v53 }
 0x120   :  { %434 = vmatpush1.bf16.msra.mxu1 %v784_v54 }
 0x121   :  { %435 = vmatprep.subr.bf16.mxu1 %v789_v55 }
 0x124   :  { %436 = vmatpush1.bf16.msra.mxu1 %v787_v56 }
 0x125   :  { %437 = vmatprep.subr.bf16.mxu1 %v792_v57 }
 0x128   :  { %438 = vmatpush1.bf16.msra.mxu1 %v790_v58 }
 0x129   :  { %439 = vmatprep.subr.bf16.mxu1 %v795_v59 }
 0x12c   :  { %440 = vmatpush1.bf16.msra.mxu1 %v793_v60 }
 0x12d   :  { %441 = vmatprep.subr.bf16.mxu1 %v798_v61 }
 0x130   :  { %442 = vmatpush1.bf16.msra.mxu1 %v796_v62 }
 0x131   :  { %443 = vmatprep.subr.bf16.mxu1 %v801_v63 }
 0x134   :  { %444 = vmatpush1.bf16.msra.mxu1 %v799_v0 }
 0x135   :  { %713 = vmatprep.subr.bf16.mxu1 %v819_v30 }
 0x1ea   :  { %v325_v1 = vpop.f32.mrb[4].mxu1 }
 0x1eb   :  { %v331_v2 = vmul.f32 %v325_v1, %v261_v38  ;;  %v711_v3 = vpop.f32.mrb[5].mxu1 }
 0x1ec   :  { %v328_v4 = vpop.f32.mrb[6].mxu1 }
 0x1ed   :  { %v332_v5 = vpack.c.bf16 %v331_v2, %v331_v2  ;;  %v712_v6 = vpop.f32.mrb[7].mxu1 }
 0x1ef   :  { %462 = vmatmul.mubr.bf16.vlgmr.msra.gmra.mrb[8].mxu1 %v332_v5 }
 0x1f0   :  { %714 = vmatpush3.bf16.msra.mxu1 %v955_v31  ;;  %715 = vmatprep.mubr.msk.bf16.mxu1 %vm820_vm2, %v819_v30 }
 0x2c2   :  { %v463_v15 = vpop.f32.mrb[8].mxu1 }
 0x2c3   :  { %v465_v16 = vpop.f32.mrb[9].mxu1 }
 0x2c4   :  { %v477_v17 = vadd.f32 %v683_v14, %v465_v16  ;;  %v467_v18 = vpop.f32.mrb[10].mxu1 }
 0x2c5   :  { %v468_v19 = vpop.f32.mrb[11].mxu1 }
 0x2c6   :  { %v684_v20 = vmul.f32 -1.442695, %v477_v17 }
 0x2c8   :  { %814 = vpow2.f32 %v684_v20 }
 0x2d2   :  { %v815_v21 = vpop.eup %814 }
 0x2d3   :  { %v481_v22 = vadd.f32 1.0, %v815_v21 }
 0x2d5   :  { %816 = vrcp.f32 %v481_v22 }
 0x2df   :  { %v817_v23 = vpop.eup %816 }
 0x2e0   :  { %v484_v24 = vpack.c.bf16 %v817_v23, %v817_v23 }
 0x2e2   :  { %716 = vmatmul.mubr.msk.bf16.vlgmr.msra.gmra.mrb[12].mxu1 %vm283_vm3, %v484_v24 }
 0x3b5   :  { %v522_v26 = vpop.f32.mrb[12].mxu1 }
 0x3b6   :  { %v528_v27 = vmul.f32 %v522_v26, %v463_v15  ;;  %v717_v28 = vpop.f32.mrb[13].mxu1 }
 0x3b7   :  { %v525_v29 = vpop.f32.mrb[14].mxu1 }
 0x3b8   :  { %v529_v30 = vpack.c.bf16 %v528_v27, %v528_v27  ;;  %v718_v31 = vpop.f32.mrb[15].mxu1 }
 0x3ba   :  { %736 = vmatmul.mubr.bf16.vlgmr.msra.gmra.mrb[4].mxu0 %v529_v30 }
 0x48d   :  { %v628_v32 = vpop.f32.mrb[4].mxu0 }
 0x48e   :  { %634 = vst [vmem:[%s1067_s9] sm:$0xff] %v628_v32  ;;  %v737_v33 = vpop.f32.mrb[5].mxu0 }
 0x48f   :  { %v631_v34 = vpop.f32.mrb[6].mxu0 }
 0x490   :  { %v738_v35 = vpop.f32.mrb[7].mxu0 }

// kernel: _lambda_.8
= control target key start
LH: loop header
LB: loop body
LE: loop exit
PB: predicated region body
PF: predicated region fallthrough
CT: control target
= control target key end

     0   :  { %v940_v1 = vmov 0   ;;  %vm344_vm0 = vcmask 1043456   ;;  %v941_v39 = vmov 0.0   ;;  %vm942_vm1 = vmmov 0   ;;  %s1207_s3 = inlined_call_operand.vmem [shape: bf16[128,136], index: 3, kind: input, shape index: {}]   ;;  %s1208_s2 = inlined_call_operand.vmem [shape: bf16[128,136], index: 2, kind: input, shape index: {}]   ;;  %s1209_s1 = inlined_call_operand.vmem [shape: f32[16,128], index: 1, kind: input, shape index: {}]   ;;  %s1210_s0 = inlined_call_operand.vmem [shape: f32[16,128], index: 0, kind: input, shape index: {}]   ;;  %s1211_s4 = inlined_call_operand.vmem [shape: bf16[8,128], index: 4, kind: input, shape index: {}]   ;;  %s1212_s6 = inlined_call_operand.vmem [shape: bf16[128,136], index: 6, kind: input, shape index: {}]   ;;  %s1213_s5 = inlined_call_operand.vmem [shape: f32[1,8], index: 5, kind: input, shape index: {}]   ;;  %s1214_s8 = inlined_call_operand.vmem [shape: bf16[128,128], index: 8, kind: input, shape index: {}]   ;;  %s1215_s7 = inlined_call_operand.vmem [shape: f32[1,8], index: 7, kind: input, shape index: {}]   ;;  %s1216_s9 = inlined_call_operand.vmem [shape: bf16[16,128], index: 9, kind: output, shape index: {}]  }
   0x1   :  { %v844_v0 = vld [vmem:[%s1207_s3 + $0x4] ss:$8 sps:$4 sm:$0xff]   ;;  %183 = vmatprep.mubr.bf16.mxu0 %v940_v1  ;;  %520 = vmatprep.mubr.bf16.mxu1 %v940_v1  ;;  %v846_v2 = vld [vmem:[%s1207_s3] ss:$8 sps:$4 sm:$0xff]   ;;  %v847_v3 = vld [vmem:[%s1207_s3 + $0x14] ss:$8 sps:$4 sm:$0xff]  }
   0x2   :  { %151 = vmatprep.subr.bf16.mxu0 %v844_v0  ;;  %v849_v4 = vld [vmem:[%s1207_s3 + $0x10] ss:$8 sps:$4 sm:$0xff]   ;;  %v850_v5 = vld [vmem:[%s1207_s3 + $0x24] ss:$8 sps:$4 sm:$0xff]   ;;  %v852_v6 = vld [vmem:[%s1207_s3 + $0x20] ss:$8 sps:$4 sm:$0xff]  }
   0x3   :  { %152 = vmatpush1.bf16.msra.mxu0 %v846_v2  ;;  %v853_v7 = vld [vmem:[%s1207_s3 + $0x34] ss:$8 sps:$4 sm:$0xff]   ;;  %v855_v8 = vld [vmem:[%s1207_s3 + $0x30] ss:$8 sps:$4 sm:$0xff]   ;;  %v856_v9 = vld [vmem:[%s1207_s3 + $0x44] ss:$8 sps:$4 sm:$0xff]  }
   0x4   :  { %153 = vmatprep.subr.bf16.mxu0 %v847_v3  ;;  %v858_v10 = vld [vmem:[%s1207_s3 + $0x40] ss:$8 sps:$4 sm:$0xff]   ;;  %v859_v11 = vld [vmem:[%s1207_s3 + $0x54] ss:$8 sps:$4 sm:$0xff]   ;;  %v861_v12 = vld [vmem:[%s1207_s3 + $0x50] ss:$8 sps:$4 sm:$0xff]  }
   0x5   :  { %v862_v13 = vld [vmem:[%s1207_s3 + $0x64] ss:$8 sps:$4 sm:$0xff]   ;;  %v864_v14 = vld [vmem:[%s1207_s3 + $0x60] ss:$8 sps:$4 sm:$0xff]   ;;  %v865_v15 = vld [vmem:[%s1207_s3 + $0x74] ss:$8 sps:$4 sm:$0xff]  }
   0x6   :  { %v867_v16 = vld [vmem:[%s1207_s3 + $0x70] ss:$8 sps:$4 sm:$0xff]   ;;  %v36_v17 = vld [vmem:[%s1209_s1] sm:$0xff]  ;;  %v37_v18 = vld [vmem:[%s1209_s1 + $0x8] sm:$0xff]  ;;  %vm340_vm2 = vcmask 64512  }
   0x7   :  { %154 = vmatpush1.bf16.msra.mxu0 %v849_v4  ;;  %v870_v19 = vld [vmem:[%s1208_s2 + $0x4] ss:$8 sps:$4 sm:$0xff]   ;;  %v38_v20 = vpack.c.bf16 %v37_v18, %v36_v17  ;;  %v868_v21 = vld [vmem:[%s1208_s2] ss:$8 sps:$4 sm:$0xff]   ;;  %v873_v22 = vld [vmem:[%s1208_s2 + $0x14] ss:$8 sps:$4 sm:$0xff]  }
   0x8   :  { %155 = vmatprep.subr.bf16.mxu0 %v850_v5  ;;  %v871_v23 = vld [vmem:[%s1208_s2 + $0x10] ss:$8 sps:$4 sm:$0xff]   ;;  %v876_v24 = vld [vmem:[%s1208_s2 + $0x24] ss:$8 sps:$4 sm:$0xff]   ;;  %v874_v25 = vld [vmem:[%s1208_s2 + $0x20] ss:$8 sps:$4 sm:$0xff]  }
   0x9   :  { %v879_v26 = vld [vmem:[%s1208_s2 + $0x34] ss:$8 sps:$4 sm:$0xff]   ;;  %v877_v27 = vld [vmem:[%s1208_s2 + $0x30] ss:$8 sps:$4 sm:$0xff]   ;;  %v882_v28 = vld [vmem:[%s1208_s2 + $0x44] ss:$8 sps:$4 sm:$0xff]  }
   0xa   :  { %v880_v29 = vld [vmem:[%s1208_s2 + $0x40] ss:$8 sps:$4 sm:$0xff]   ;;  %v885_v30 = vld [vmem:[%s1208_s2 + $0x54] ss:$8 sps:$4 sm:$0xff]   ;;  %v883_v31 = vld [vmem:[%s1208_s2 + $0x50] ss:$8 sps:$4 sm:$0xff]  }
   0xb   :  { %156 = vmatpush1.bf16.msra.mxu0 %v852_v6  ;;  %v888_v32 = vld [vmem:[%s1208_s2 + $0x64] ss:$8 sps:$4 sm:$0xff]   ;;  %v886_v33 = vld [vmem:[%s1208_s2 + $0x60] ss:$8 sps:$4 sm:$0xff]   ;;  %v891_v34 = vld [vmem:[%s1208_s2 + $0x74] ss:$8 sps:$4 sm:$0xff]  }
   0xc   :  { %157 = vmatprep.subr.bf16.mxu0 %v853_v7  ;;  %v889_v35 = vld [vmem:[%s1208_s2 + $0x70] ss:$8 sps:$4 sm:$0xff]   ;;  %v33_v36 = vld [vmem:[%s1210_s0] sm:$0xff]  ;;  %v34_v37 = vld [vmem:[%s1210_s0 + $0x8] sm:$0xff] }
   0xd   :  { %v35_v38 = vpack.c.bf16 %v34_v37, %v33_v36  ;;  %v317_v40 = vld [vmem:[%s1211_s4] sm:$0xf]  ;;  %v892_v42 = vld [vmem:[%s1212_s6 + $0x4] ss:$8 sps:$4 sm:$0xff]   ;;  %v895_v44 = vld [vmem:[%s1212_s6 + $0x14] ss:$8 sps:$4 sm:$0xff]  }
   0xe   :  { %v1107_v41 = vsel %vm344_vm0, %v317_v40, 0  ;;  %v894_v43 = vld [vmem:[%s1212_s6] ss:$8 sps:$4 sm:$0xff]   ;;  %488 = vmatprep.subr.bf16.mxu1 %v892_v42  ;;  %v897_v45 = vld [vmem:[%s1212_s6 + $0x10] ss:$8 sps:$4 sm:$0xff]  }
   0xf   :  { %158 = vmatpush1.bf16.msra.mxu0 %v855_v8  ;;  %489 = vmatpush1.bf16.msra.mxu1 %v894_v43  ;;  %v898_v46 = vld [vmem:[%s1212_s6 + $0x24] ss:$8 sps:$4 sm:$0xff]   ;;  %v900_v47 = vld [vmem:[%s1212_s6 + $0x20] ss:$8 sps:$4 sm:$0xff]   ;;  %v901_v48 = vld [vmem:[%s1212_s6 + $0x34] ss:$8 sps:$4 sm:$0xff]  }
  0x10   :  { %159 = vmatprep.subr.bf16.mxu0 %v856_v9  ;;  %490 = vmatprep.subr.bf16.mxu1 %v895_v44  ;;  %v903_v49 = vld [vmem:[%s1212_s6 + $0x30] ss:$8 sps:$4 sm:$0xff]   ;;  %v904_v50 = vld [vmem:[%s1212_s6 + $0x44] ss:$8 sps:$4 sm:$0xff]   ;;  %v906_v51 = vld [vmem:[%s1212_s6 + $0x40] ss:$8 sps:$4 sm:$0xff]  }
  0x11   :  { %v907_v52 = vld [vmem:[%s1212_s6 + $0x54] ss:$8 sps:$4 sm:$0xff]   ;;  %v909_v53 = vld [vmem:[%s1212_s6 + $0x50] ss:$8 sps:$4 sm:$0xff]   ;;  %v910_v54 = vld [vmem:[%s1212_s6 + $0x64] ss:$8 sps:$4 sm:$0xff]  }
  0x12   :  { %v751_v55 = vld [vmem:[%s1213_s5] ss:$0 sm:$0xff]  ;;  %v913_v8 = vld [vmem:[%s1212_s6 + $0x74] ss:$8 sps:$4 sm:$0xff]   ;;  %v915_v9 = vld [vmem:[%s1212_s6 + $0x70] ss:$8 sps:$4 sm:$0xff]  }
  0x13   :  { %160 = vmatpush1.bf16.msra.mxu0 %v858_v10  ;;  %491 = vmatpush1.bf16.msra.mxu1 %v897_v45  ;;  %v912_v7 = vld [vmem:[%s1212_s6 + $0x60] ss:$8 sps:$4 sm:$0xff]   ;;  %v919_v36 = vld [vmem:[%s1214_s8 + $0x18] sm:$0xff]   ;;  %v922_v40 = vld [vmem:[%s1214_s8 + $0x30] sm:$0xff]  }
  0x14   :  { %161 = vmatprep.subr.bf16.mxu0 %v859_v11  ;;  %492 = vmatprep.subr.bf16.mxu1 %v898_v46  ;;  %v771_v17 = vld [vmem:[%s1215_s7] ss:$0 sm:$0xff] }
  0x15   :  { %v920_v37 = vld [vmem:[%s1214_s8 + $0x20] sm:$0xff]  }
  0x17   :  { %162 = vmatpush1.bf16.msra.mxu0 %v861_v12  ;;  %493 = vmatpush1.bf16.msra.mxu1 %v900_v47 }
  0x18   :  { %163 = vmatprep.subr.bf16.mxu0 %v862_v13  ;;  %494 = vmatprep.subr.bf16.mxu1 %v901_v48 }
  0x1b   :  { %164 = vmatpush1.bf16.msra.mxu0 %v864_v14  ;;  %495 = vmatpush1.bf16.msra.mxu1 %v903_v49 }
  0x1c   :  { %165 = vmatprep.subr.bf16.mxu0 %v865_v15  ;;  %496 = vmatprep.subr.bf16.mxu1 %v904_v50 }
  0x1f   :  { %166 = vmatpush1.bf16.msra.mxu0 %v867_v16  ;;  %497 = vmatpush1.bf16.msra.mxu1 %v906_v51 }
  0x20   :  { %274 = vmatprep.subr.bf16.mxu0 %v870_v19  ;;  %498 = vmatprep.subr.bf16.mxu1 %v907_v52 }
  0x22   :  { %184 = vmatmul.mubr.bf16.vlgmr.msra.gmra.mrb[0].mxu0 %v38_v20 }
  0x23   :  { %275 = vmatpush1.bf16.msra.mxu0 %v868_v21  ;;  %306 = vmatprep.mubr.bf16.mxu0 %v940_v1 }
  0x24   :  { %276 = vmatprep.subr.bf16.mxu0 %v873_v22  ;;  %499 = vmatpush1.bf16.msra.mxu1 %v909_v53 }
  0x25   :  { %500 = vmatprep.subr.bf16.mxu1 %v910_v54 }
  0x27   :  { %277 = vmatpush1.bf16.msra.mxu0 %v871_v23 }
  0x28   :  { %278 = vmatprep.subr.bf16.mxu0 %v876_v24  ;;  %501 = vmatpush1.bf16.msra.mxu1 %v912_v7 }
  0x29   :  { %502 = vmatprep.subr.bf16.mxu1 %v913_v8 }
  0x2b   :  { %279 = vmatpush1.bf16.msra.mxu0 %v874_v25 }
  0x2c   :  { %280 = vmatprep.subr.bf16.mxu0 %v879_v26  ;;  %503 = vmatpush1.bf16.msra.mxu1 %v915_v9 }
  0x2d   :  { %811 = vmatprep.subr.bf16.mxu1 %v941_v39 }
  0x2f   :  { %281 = vmatpush1.bf16.msra.mxu0 %v877_v27 }
  0x30   :  { %282 = vmatprep.subr.bf16.mxu0 %v882_v28 }
  0x33   :  { %283 = vmatpush1.bf16.msra.mxu0 %v880_v29 }
  0x34   :  { %284 = vmatprep.subr.bf16.mxu0 %v885_v30 }
  0x37   :  { %285 = vmatpush1.bf16.msra.mxu0 %v883_v31 }
  0x38   :  { %286 = vmatprep.subr.bf16.mxu0 %v888_v32  ;;  %v916_v32 = vld [vmem:[%s1214_s8] sm:$0xff]  }
  0x3b   :  { %287 = vmatpush1.bf16.msra.mxu0 %v886_v33 }
  0x3c   :  { %288 = vmatprep.subr.bf16.mxu0 %v891_v34  ;;  %v917_v34 = vld [vmem:[%s1214_s8 + $0x8] sm:$0xff]  }
  0x3f   :  { %289 = vmatpush1.bf16.msra.mxu0 %v889_v35  ;;  %v918_v35 = vld [vmem:[%s1214_s8 + $0x10] sm:$0xff]  }
  0x40   :  { %805 = vmatprep.subr.bf16.mxu0 %v941_v39 }
  0x42   :  { %307 = vmatmul.mubr.bf16.vlgmr.msra.gmra.mrb[0].mxu0 %v35_v38  ;;  %v921_v38 = vld [vmem:[%s1214_s8 + $0x28] sm:$0xff]  }
  0x43   :  { %807 = vmatprep.mubr.msk.bf16.mxu0 %vm942_vm1, %v941_v39  ;;  %806 = vmatpush3.bf16.msra.mxu0 %v1107_v41 }
 0x115   :  { %v308_v56 = vpop.f32.mrb[0].mxu0 }
 0x116   :  { %v310_v57 = vpop.f32.mrb[1].mxu0 }
 0x117   :  { %v325_v58 = vadd.f32 %v751_v55, %v310_v57  ;;  %v312_v59 = vpop.f32.mrb[2].mxu0 }
 0x118   :  { %v314_v60 = vpop.f32.mrb[3].mxu0 }
 0x119   :  { %v752_v61 = vmul.f32 -1.442695, %v325_v58  ;;  %v326_v62 = vadd.f32 %v751_v55, %v314_v60 }
 0x11b   :  { %924 = vpow2.f32 %v752_v61  ;;  %v753_v63 = vmul.f32 -1.442695, %v326_v62 }
 0x11d   :  { %926 = vpow2.f32 %v753_v63 }
 0x125   :  { %v925_v0 = vpop.eup %924 }
 0x126   :  { %v333_v1 = vadd.f32 1.0, %v925_v0 }
 0x127   :  { %v927_v2 = vpop.eup %926 }
 0x128   :  { %v334_v3 = vadd.f32 1.0, %v927_v2  ;;  %928 = vrcp.f32 %v333_v1 }
 0x12a   :  { %930 = vrcp.f32 %v334_v3 }
 0x132   :  { %v929_v4 = vpop.eup %928 }
 0x134   :  { %v931_v5 = vpop.eup %930 }
 0x135   :  { %v339_v6 = vpack.c.bf16 %v931_v5, %v929_v4 }
 0x137   :  { %808 = vmatmul.mubr.msk.bf16.vlgmr.msra.gmra.mrb[4].mxu0 %vm340_vm2, %v339_v6 }
 0x20a   :  { %v382_v10 = vpop.f32.mrb[4].mxu0 }
 0x20b   :  { %v389_v11 = vmul.f32 %v382_v10, %v308_v56  ;;  %v809_v12 = vpop.f32.mrb[5].mxu0 }
 0x20c   :  { %v385_v13 = vpop.f32.mrb[6].mxu0 }
 0x20d   :  { %v390_v14 = vmul.f32 %v385_v13, %v312_v59  ;;  %v810_v15 = vpop.f32.mrb[7].mxu0 }
 0x20f   :  { %v391_v16 = vpack.c.bf16 %v390_v14, %v389_v11 }
 0x211   :  { %521 = vmatmul.mubr.bf16.vlgmr.msra.gmra.mrb[0].mxu1 %v391_v16 }
 0x212   :  { %812 = vmatpush3.bf16.msra.mxu1 %v1107_v41  ;;  %813 = vmatprep.mubr.msk.bf16.mxu1 %vm942_vm1, %v941_v39  ;;  %v923_v41 = vld [vmem:[%s1214_s8 + $0x38] sm:$0xff]  }
 0x213   :  { %817 = vmatprep.subr.bf16.mxu1 %v941_v39 }
 0x2e4   :  { %v522_v18 = vpop.f32.mrb[0].mxu1 }
 0x2e5   :  { %v524_v19 = vpop.f32.mrb[1].mxu1 }
 0x2e6   :  { %v538_v20 = vadd.f32 %v771_v17, %v524_v19  ;;  %v526_v21 = vpop.f32.mrb[2].mxu1 }
 0x2e7   :  { %v528_v22 = vpop.f32.mrb[3].mxu1 }
 0x2e8   :  { %v772_v23 = vmul.f32 -1.442695, %v538_v20  ;;  %v539_v24 = vadd.f32 %v771_v17, %v528_v22 }
 0x2ea   :  { %932 = vpow2.f32 %v772_v23  ;;  %v773_v25 = vmul.f32 -1.442695, %v539_v24 }
 0x2ec   :  { %934 = vpow2.f32 %v773_v25 }
 0x2f4   :  { %v933_v26 = vpop.eup %932 }
 0x2f5   :  { %v546_v27 = vadd.f32 1.0, %v933_v26 }
 0x2f6   :  { %v935_v28 = vpop.eup %934 }
 0x2f7   :  { %v547_v29 = vadd.f32 1.0, %v935_v28  ;;  %936 = vrcp.f32 %v546_v27 }
 0x2f9   :  { %938 = vrcp.f32 %v547_v29 }
 0x301   :  { %v937_v30 = vpop.eup %936 }
 0x303   :  { %v939_v31 = vpop.eup %938 }
 0x304   :  { %v552_v33 = vpack.c.bf16 %v939_v31, %v937_v30 }
 0x306   :  { %814 = vmatmul.mubr.msk.bf16.vlgmr.msra.gmra.mrb[4].mxu1 %vm340_vm2, %v552_v33 }
 0x307   :  { %818 = vmatpush3.bf16.msra.mxu1 %v916_v32  ;;  %833 = vmatprep.mubr.msk.bf16.mxu1 %vm942_vm1, %v941_v39 }
 0x308   :  { %819 = vmatprep.subr.bf16.mxu1 %v941_v39 }
 0x30b   :  { %820 = vmatpush3.bf16.msra.mxu1 %v917_v34 }
 0x30c   :  { %821 = vmatprep.subr.bf16.mxu1 %v941_v39 }
 0x30f   :  { %822 = vmatpush3.bf16.msra.mxu1 %v918_v35 }
 0x310   :  { %823 = vmatprep.subr.bf16.mxu1 %v941_v39 }
 0x313   :  { %824 = vmatpush3.bf16.msra.mxu1 %v919_v36 }
 0x314   :  { %825 = vmatprep.subr.bf16.mxu1 %v941_v39 }
 0x317   :  { %826 = vmatpush3.bf16.msra.mxu1 %v920_v37 }
 0x318   :  { %827 = vmatprep.subr.bf16.mxu1 %v941_v39 }
 0x31b   :  { %828 = vmatpush3.bf16.msra.mxu1 %v921_v38 }
 0x31c   :  { %829 = vmatprep.subr.bf16.mxu1 %v941_v39 }
 0x31f   :  { %830 = vmatpush3.bf16.msra.mxu1 %v922_v40 }
 0x320   :  { %831 = vmatprep.subr.bf16.mxu1 %v941_v39 }
 0x323   :  { %832 = vmatpush3.bf16.msra.mxu1 %v923_v41 }
 0x3d9   :  { %v590_v42 = vpop.f32.mrb[4].mxu1 }
 0x3da   :  { %v597_v43 = vmul.f32 %v590_v42, %v522_v18  ;;  %v815_v44 = vpop.f32.mrb[5].mxu1 }
 0x3db   :  { %v593_v45 = vpop.f32.mrb[6].mxu1 }
 0x3dc   :  { %v598_v46 = vmul.f32 %v593_v45, %v526_v21  ;;  %v816_v47 = vpop.f32.mrb[7].mxu1 }
 0x3de   :  { %v599_v48 = vpack.c.bf16 %v598_v46, %v597_v43 }
 0x3e0   :  { %834 = vmatmul.mubr.bf16.vlgmr.msra.gmra.mrb[8].mxu1 %v599_v48 }
 0x4b3   :  { %v698_v49 = vpop.f32.mrb[8].mxu1 }
 0x4b4   :  { %v835_v50 = vpop.f32.mrb[9].mxu1 }
 0x4b5   :  { %v701_v51 = vpop.f32.mrb[10].mxu1 }
 0x4b6   :  { %v790_v52 = vpack.c.bf16 %v701_v51, %v698_v49  ;;  %v836_v53 = vpop.f32.mrb[11].mxu1 }
 0x4b8   :  { %791 = vst [vmem:[%s1216_s9] sm:$0xff] %v790_v52  }

// kernel: _lambda_.9
= control target key start
LH: loop header
LB: loop body
LE: loop exit
PB: predicated region body
PF: predicated region fallthrough
CT: control target
= control target key end

     0   :  { %v881_v1 = vmov 0   ;;  %vm331_vm0 = vcmask 1043456   ;;  %v882_v38 = vmov 0.0   ;;  %vm883_vm1 = vmmov 0   ;;  %s1141_s3 = inlined_call_operand.vmem [shape: bf16[128,136], index: 3, kind: input, shape index: {}]   ;;  %s1142_s2 = inlined_call_operand.vmem [shape: bf16[128,136], index: 2, kind: input, shape index: {}]   ;;  %s1143_s1 = inlined_call_operand.vmem [shape: f32[8,128], index: 1, kind: input, shape index: {}]   ;;  %s1144_s0 = inlined_call_operand.vmem [shape: f32[8,128], index: 0, kind: input, shape index: {}]   ;;  %s1145_s4 = inlined_call_operand.vmem [shape: bf16[8,128], index: 4, kind: input, shape index: {}]   ;;  %s1146_s6 = inlined_call_operand.vmem [shape: bf16[128,136], index: 6, kind: input, shape index: {}]   ;;  %s1147_s5 = inlined_call_operand.vmem [shape: f32[1,8], index: 5, kind: input, shape index: {}]   ;;  %s1148_s8 = inlined_call_operand.vmem [shape: bf16[128,128], index: 8, kind: input, shape index: {}]   ;;  %s1149_s7 = inlined_call_operand.vmem [shape: f32[1,8], index: 7, kind: input, shape index: {}]   ;;  %s1150_s9 = inlined_call_operand.vmem [shape: f32[8,128], index: 9, kind: output, shape index: {}]  }
   0x1   :  { %v793_v0 = vld [vmem:[%s1141_s3 + $0x4] ss:$8 sps:$4 sm:$0xff]   ;;  %181 = vmatprep.mubr.bf16.mxu0 %v881_v1  ;;  %302 = vmatprep.mubr.bf16.mxu1 %v881_v1  ;;  %v797_v3 = vld [vmem:[%s1141_s3] ss:$8 sps:$4 sm:$0xff]   ;;  %v799_v5 = vld [vmem:[%s1141_s3 + $0x14] ss:$8 sps:$4 sm:$0xff]  }
   0x2   :  { %v795_v2 = vld [vmem:[%s1142_s2 + $0x4] ss:$8 sps:$4 sm:$0xff]   ;;  %149 = vmatprep.subr.bf16.mxu0 %v793_v0  ;;  %v798_v4 = vld [vmem:[%s1142_s2] ss:$8 sps:$4 sm:$0xff]   ;;  %v801_v6 = vld [vmem:[%s1142_s2 + $0x14] ss:$8 sps:$4 sm:$0xff]  }
   0x3   :  { %270 = vmatprep.subr.bf16.mxu1 %v795_v2  ;;  %150 = vmatpush1.bf16.msra.mxu0 %v797_v3  ;;  %v803_v7 = vld [vmem:[%s1141_s3 + $0x10] ss:$8 sps:$4 sm:$0xff]   ;;  %v805_v9 = vld [vmem:[%s1141_s3 + $0x24] ss:$8 sps:$4 sm:$0xff]   ;;  %v809_v11 = vld [vmem:[%s1141_s3 + $0x20] ss:$8 sps:$4 sm:$0xff]  }
   0x4   :  { %271 = vmatpush1.bf16.msra.mxu1 %v798_v4  ;;  %151 = vmatprep.subr.bf16.mxu0 %v799_v5  ;;  %v804_v8 = vld [vmem:[%s1142_s2 + $0x10] ss:$8 sps:$4 sm:$0xff]   ;;  %v807_v10 = vld [vmem:[%s1142_s2 + $0x24] ss:$8 sps:$4 sm:$0xff]   ;;  %v810_v12 = vld [vmem:[%s1142_s2 + $0x20] ss:$8 sps:$4 sm:$0xff]  }
   0x5   :  { %272 = vmatprep.subr.bf16.mxu1 %v801_v6  ;;  %v811_v13 = vld [vmem:[%s1141_s3 + $0x34] ss:$8 sps:$4 sm:$0xff]   ;;  %v815_v15 = vld [vmem:[%s1141_s3 + $0x30] ss:$8 sps:$4 sm:$0xff]   ;;  %v817_v17 = vld [vmem:[%s1141_s3 + $0x44] ss:$8 sps:$4 sm:$0xff]  }
   0x6   :  { %v813_v14 = vld [vmem:[%s1142_s2 + $0x34] ss:$8 sps:$4 sm:$0xff]   ;;  %v816_v16 = vld [vmem:[%s1142_s2 + $0x30] ss:$8 sps:$4 sm:$0xff]   ;;  %v819_v18 = vld [vmem:[%s1142_s2 + $0x44] ss:$8 sps:$4 sm:$0xff]  }
   0x7   :  { %152 = vmatpush1.bf16.msra.mxu0 %v803_v7  ;;  %v821_v19 = vld [vmem:[%s1141_s3 + $0x40] ss:$8 sps:$4 sm:$0xff]   ;;  %v823_v21 = vld [vmem:[%s1141_s3 + $0x54] ss:$8 sps:$4 sm:$0xff]   ;;  %v827_v23 = vld [vmem:[%s1141_s3 + $0x50] ss:$8 sps:$4 sm:$0xff]  }
   0x8   :  { %273 = vmatpush1.bf16.msra.mxu1 %v804_v8  ;;  %153 = vmatprep.subr.bf16.mxu0 %v805_v9  ;;  %v822_v20 = vld [vmem:[%s1142_s2 + $0x40] ss:$8 sps:$4 sm:$0xff]   ;;  %v825_v22 = vld [vmem:[%s1142_s2 + $0x54] ss:$8 sps:$4 sm:$0xff]   ;;  %v828_v24 = vld [vmem:[%s1142_s2 + $0x50] ss:$8 sps:$4 sm:$0xff]  }
   0x9   :  { %274 = vmatprep.subr.bf16.mxu1 %v807_v10  ;;  %v829_v25 = vld [vmem:[%s1141_s3 + $0x64] ss:$8 sps:$4 sm:$0xff]   ;;  %v833_v27 = vld [vmem:[%s1141_s3 + $0x60] ss:$8 sps:$4 sm:$0xff]   ;;  %v835_v29 = vld [vmem:[%s1141_s3 + $0x74] ss:$8 sps:$4 sm:$0xff]  }
   0xa   :  { %v831_v26 = vld [vmem:[%s1142_s2 + $0x64] ss:$8 sps:$4 sm:$0xff]   ;;  %v834_v28 = vld [vmem:[%s1142_s2 + $0x60] ss:$8 sps:$4 sm:$0xff]   ;;  %v837_v30 = vld [vmem:[%s1142_s2 + $0x74] ss:$8 sps:$4 sm:$0xff]  }
   0xb   :  { %154 = vmatpush1.bf16.msra.mxu0 %v809_v11  ;;  %v839_v31 = vld [vmem:[%s1141_s3 + $0x70] ss:$8 sps:$4 sm:$0xff]   ;;  %v35_v33 = vld [vmem:[%s1143_s1] sm:$0xff]  ;;  %vm327_vm2 = vcmask 64512   ;;  %v846_v59 = vld [vmem:[%s1146_s6 + $0x14] ss:$8 sps:$4 sm:$0xff]  }
   0xc   :  { %275 = vmatpush1.bf16.msra.mxu1 %v810_v12  ;;  %155 = vmatprep.subr.bf16.mxu0 %v811_v13  ;;  %v840_v32 = vld [vmem:[%s1142_s2 + $0x70] ss:$8 sps:$4 sm:$0xff]   ;;  %v33_v34 = vld [vmem:[%s1144_s0] sm:$0xff]  ;;  %v36_v35 = vpack.c.bf16 %v35_v33, %v35_v33  ;;  %v852_v63 = vld [vmem:[%s1146_s6 + $0x34] ss:$8 sps:$4 sm:$0xff]  }
   0xd   :  { %276 = vmatprep.subr.bf16.mxu1 %v813_v14  ;;  %v34_v36 = vpack.c.bf16 %v33_v34, %v33_v34  ;;  %v311_v37 = vld [vmem:[%s1145_s4] sm:$0xf]  ;;  %v843_v40 = vld [vmem:[%s1146_s6 + $0x4] ss:$8 sps:$4 sm:$0xff]   ;;  %v844_v60 = vld [vmem:[%s1146_s6 + $0x10] ss:$8 sps:$4 sm:$0xff]  }
   0xe   :  { %v333_v39 = vsel %vm331_vm0, %v311_v37, 0  ;;  %v715_v46 = vld [vmem:[%s1147_s5] ss:$0 sm:$0xff]  ;;  %v849_v61 = vld [vmem:[%s1146_s6 + $0x24] ss:$8 sps:$4 sm:$0xff]   ;;  %v872_v33 = vld [vmem:[%s1148_s8 + $0x38] sm:$0xff]  }
   0xf   :  { %156 = vmatpush1.bf16.msra.mxu0 %v815_v15  ;;  %v841_v57 = vld [vmem:[%s1146_s6] ss:$8 sps:$4 sm:$0xff]   ;;  %v850_v0 = vld [vmem:[%s1146_s6 + $0x30] ss:$8 sps:$4 sm:$0xff]   ;;  %v858_v3 = vld [vmem:[%s1146_s6 + $0x54] ss:$8 sps:$4 sm:$0xff]  }
  0x10   :  { %277 = vmatpush1.bf16.msra.mxu1 %v816_v16  ;;  %157 = vmatprep.subr.bf16.mxu0 %v817_v17  ;;  %v847_v62 = vld [vmem:[%s1146_s6 + $0x20] ss:$8 sps:$4 sm:$0xff]   ;;  %v856_v4 = vld [vmem:[%s1146_s6 + $0x50] ss:$8 sps:$4 sm:$0xff]   ;;  %v861_v5 = vld [vmem:[%s1146_s6 + $0x64] ss:$8 sps:$4 sm:$0xff]  }
  0x11   :  { %278 = vmatprep.subr.bf16.mxu1 %v819_v18  ;;  %v853_v2 = vld [vmem:[%s1146_s6 + $0x40] ss:$8 sps:$4 sm:$0xff]   ;;  %v864_v7 = vld [vmem:[%s1146_s6 + $0x74] ss:$8 sps:$4 sm:$0xff]   ;;  %v862_v8 = vld [vmem:[%s1146_s6 + $0x70] ss:$8 sps:$4 sm:$0xff]  }
  0x12   :  { %v859_v6 = vld [vmem:[%s1146_s6 + $0x60] ss:$8 sps:$4 sm:$0xff]  }
  0x13   :  { %158 = vmatpush1.bf16.msra.mxu0 %v821_v19  ;;  %v734_v15 = vld [vmem:[%s1149_s7] ss:$0 sm:$0xff] }
  0x14   :  { %279 = vmatpush1.bf16.msra.mxu1 %v822_v20  ;;  %159 = vmatprep.subr.bf16.mxu0 %v823_v21 }
  0x15   :  { %280 = vmatprep.subr.bf16.mxu1 %v825_v22 }
  0x17   :  { %160 = vmatpush1.bf16.msra.mxu0 %v827_v23 }
  0x18   :  { %281 = vmatpush1.bf16.msra.mxu1 %v828_v24  ;;  %161 = vmatprep.subr.bf16.mxu0 %v829_v25  ;;  %v865_v25 = vld [vmem:[%s1148_s8] sm:$0xff]  }
  0x19   :  { %282 = vmatprep.subr.bf16.mxu1 %v831_v26 }
  0x1b   :  { %162 = vmatpush1.bf16.msra.mxu0 %v833_v27  ;;  %v866_v27 = vld [vmem:[%s1148_s8 + $0x8] sm:$0xff]  }
  0x1c   :  { %283 = vmatpush1.bf16.msra.mxu1 %v834_v28  ;;  %163 = vmatprep.subr.bf16.mxu0 %v835_v29  ;;  %v867_v28 = vld [vmem:[%s1148_s8 + $0x10] sm:$0xff]   ;;  %v868_v29 = vld [vmem:[%s1148_s8 + $0x18] sm:$0xff]  }
  0x1d   :  { %284 = vmatprep.subr.bf16.mxu1 %v837_v30  ;;  %v869_v30 = vld [vmem:[%s1148_s8 + $0x20] sm:$0xff]  }
  0x1f   :  { %164 = vmatpush1.bf16.msra.mxu0 %v839_v31  ;;  %v870_v31 = vld [vmem:[%s1148_s8 + $0x28] sm:$0xff]  }
  0x20   :  { %285 = vmatpush1.bf16.msra.mxu1 %v840_v32  ;;  %764 = vmatprep.subr.bf16.mxu0 %v882_v38  ;;  %v871_v32 = vld [vmem:[%s1148_s8 + $0x30] sm:$0xff]  }
  0x21   :  { %758 = vmatprep.subr.bf16.mxu1 %v882_v38 }
  0x22   :  { %182 = vmatmul.mubr.bf16.vlgmr.msra.gmra.mrb[0].mxu0 %v36_v35 }
  0x23   :  { %303 = vmatmul.mubr.bf16.vlgmr.msra.gmra.mrb[0].mxu1 %v34_v36  ;;  %765 = vmatpush3.bf16.msra.mxu0 %v333_v39 }
  0x24   :  { %759 = vmatpush3.bf16.msra.mxu1 %v333_v39  ;;  %770 = vmatprep.subr.bf16.mxu0 %v882_v38 }
  0x25   :  { %760 = vmatprep.mubr.msk.bf16.mxu1 %vm883_vm1, %v882_v38  ;;  %766 = vmatprep.mubr.msk.bf16.mxu0 %vm883_vm1, %v882_v38 }
  0x26   :  { %473 = vmatprep.subr.bf16.mxu1 %v843_v40 }
  0xf5   :  { %v183_v41 = vpop.f32.mrb[0].mxu0 }
  0xf6   :  { %v304_v42 = vpop.f32.mrb[0].mxu1  ;;  %v185_v44 = vpop.f32.mrb[1].mxu0 }
  0xf7   :  { %v305_v43 = vadd.f32 %v304_v42, %v183_v41  ;;  %v306_v45 = vpop.f32.mrb[1].mxu1  ;;  %v187_v48 = vpop.f32.mrb[2].mxu0 }
  0xf8   :  { %v307_v47 = vadd.f32 %v306_v45, %v185_v44  ;;  %v308_v49 = vpop.f32.mrb[2].mxu1  ;;  %v188_v50 = vpop.f32.mrb[3].mxu0 }
  0xf9   :  { %v309_v51 = vpop.f32.mrb[3].mxu1 }
  0xfa   :  { %v319_v52 = vadd.f32 %v715_v46, %v307_v47 }
  0xfc   :  { %v716_v53 = vmul.f32 -1.442695, %v319_v52 }
  0xfe   :  { %873 = vpow2.f32 %v716_v53 }
 0x108   :  { %v874_v54 = vpop.eup %873 }
 0x109   :  { %v323_v55 = vadd.f32 1.0, %v874_v54 }
 0x10b   :  { %875 = vrcp.f32 %v323_v55 }
 0x115   :  { %v876_v56 = vpop.eup %875 }
 0x116   :  { %v326_v58 = vpack.c.bf16 %v876_v56, %v876_v56 }
 0x118   :  { %761 = vmatmul.mubr.msk.bf16.vlgmr.msra.gmra.mrb[4].mxu1 %vm327_vm2, %v326_v58 }
 0x119   :  { %474 = vmatpush1.bf16.msra.mxu1 %v841_v57  ;;  %505 = vmatprep.mubr.bf16.mxu1 %v881_v1  ;;  %v855_v1 = vld [vmem:[%s1146_s6 + $0x44] ss:$8 sps:$4 sm:$0xff]  }
 0x11a   :  { %475 = vmatprep.subr.bf16.mxu1 %v846_v59 }
 0x11d   :  { %476 = vmatpush1.bf16.msra.mxu1 %v844_v60 }
 0x11e   :  { %477 = vmatprep.subr.bf16.mxu1 %v849_v61 }
 0x121   :  { %478 = vmatpush1.bf16.msra.mxu1 %v847_v62 }
 0x122   :  { %479 = vmatprep.subr.bf16.mxu1 %v852_v63 }
 0x125   :  { %480 = vmatpush1.bf16.msra.mxu1 %v850_v0 }
 0x126   :  { %481 = vmatprep.subr.bf16.mxu1 %v855_v1 }
 0x129   :  { %482 = vmatpush1.bf16.msra.mxu1 %v853_v2 }
 0x12a   :  { %483 = vmatprep.subr.bf16.mxu1 %v858_v3 }
 0x12d   :  { %484 = vmatpush1.bf16.msra.mxu1 %v856_v4 }
 0x12e   :  { %485 = vmatprep.subr.bf16.mxu1 %v861_v5 }
 0x131   :  { %486 = vmatpush1.bf16.msra.mxu1 %v859_v6 }
 0x132   :  { %487 = vmatprep.subr.bf16.mxu1 %v864_v7 }
 0x135   :  { %488 = vmatpush1.bf16.msra.mxu1 %v862_v8 }
 0x1eb   :  { %v369_v9 = vpop.f32.mrb[4].mxu1 }
 0x1ec   :  { %v375_v10 = vmul.f32 %v369_v9, %v305_v43  ;;  %v762_v11 = vpop.f32.mrb[5].mxu1 }
 0x1ed   :  { %v372_v12 = vpop.f32.mrb[6].mxu1 }
 0x1ee   :  { %v376_v13 = vpack.c.bf16 %v375_v10, %v375_v10  ;;  %v763_v14 = vpop.f32.mrb[7].mxu1 }
 0x1f0   :  { %506 = vmatmul.mubr.bf16.vlgmr.msra.gmra.mrb[8].mxu1 %v376_v13 }
 0x2c3   :  { %v507_v16 = vpop.f32.mrb[8].mxu1 }
 0x2c4   :  { %v509_v17 = vpop.f32.mrb[9].mxu1 }
 0x2c5   :  { %v521_v18 = vadd.f32 %v734_v15, %v509_v17  ;;  %v511_v19 = vpop.f32.mrb[10].mxu1 }
 0x2c6   :  { %v512_v20 = vpop.f32.mrb[11].mxu1 }
 0x2c7   :  { %v735_v21 = vmul.f32 -1.442695, %v521_v18 }
 0x2c9   :  { %877 = vpow2.f32 %v735_v21 }
 0x2d3   :  { %v878_v22 = vpop.eup %877 }
 0x2d4   :  { %v525_v23 = vadd.f32 1.0, %v878_v22 }
 0x2d6   :  { %879 = vrcp.f32 %v525_v23 }
 0x2e0   :  { %v880_v24 = vpop.eup %879 }
 0x2e1   :  { %v528_v26 = vpack.c.bf16 %v880_v24, %v880_v24 }
 0x2e3   :  { %767 = vmatmul.mubr.msk.bf16.vlgmr.msra.gmra.mrb[4].mxu0 %vm327_vm2, %v528_v26 }
 0x2e4   :  { %771 = vmatpush3.bf16.msra.mxu0 %v865_v25  ;;  %786 = vmatprep.mubr.msk.bf16.mxu0 %vm883_vm1, %v882_v38 }
 0x2e5   :  { %772 = vmatprep.subr.bf16.mxu0 %v882_v38 }
 0x2e8   :  { %773 = vmatpush3.bf16.msra.mxu0 %v866_v27 }
 0x2e9   :  { %774 = vmatprep.subr.bf16.mxu0 %v882_v38 }
 0x2ec   :  { %775 = vmatpush3.bf16.msra.mxu0 %v867_v28 }
 0x2ed   :  { %776 = vmatprep.subr.bf16.mxu0 %v882_v38 }
 0x2f0   :  { %777 = vmatpush3.bf16.msra.mxu0 %v868_v29 }
 0x2f1   :  { %778 = vmatprep.subr.bf16.mxu0 %v882_v38 }
 0x2f4   :  { %779 = vmatpush3.bf16.msra.mxu0 %v869_v30 }
 0x2f5   :  { %780 = vmatprep.subr.bf16.mxu0 %v882_v38 }
 0x2f8   :  { %781 = vmatpush3.bf16.msra.mxu0 %v870_v31 }
 0x2f9   :  { %782 = vmatprep.subr.bf16.mxu0 %v882_v38 }
 0x2fc   :  { %783 = vmatpush3.bf16.msra.mxu0 %v871_v32 }
 0x2fd   :  { %784 = vmatprep.subr.bf16.mxu0 %v882_v38 }
 0x300   :  { %785 = vmatpush3.bf16.msra.mxu0 %v872_v33 }
 0x3b6   :  { %v566_v34 = vpop.f32.mrb[4].mxu0 }
 0x3b7   :  { %v572_v35 = vmul.f32 %v566_v34, %v507_v16  ;;  %v768_v36 = vpop.f32.mrb[5].mxu0 }
 0x3b8   :  { %v569_v37 = vpop.f32.mrb[6].mxu0 }
 0x3b9   :  { %v573_v39 = vpack.c.bf16 %v572_v35, %v572_v35  ;;  %v769_v40 = vpop.f32.mrb[7].mxu0 }
 0x3bb   :  { %787 = vmatmul.mubr.bf16.vlgmr.msra.gmra.mrb[8].mxu0 %v573_v39 }
 0x48e   :  { %v672_v41 = vpop.f32.mrb[8].mxu0 }
 0x48f   :  { %678 = vst [vmem:[%s1150_s9] sm:$0xff] %v672_v41  ;;  %v788_v42 = vpop.f32.mrb[9].mxu0 }
 0x490   :  { %v675_v43 = vpop.f32.mrb[10].mxu0 }
 0x491   :  { %v789_v38 = vpop.f32.mrb[11].mxu0 }

</bundles_post_ra>
